<compile_context>
chip_gen: v6e
topology: v6e:2x2x1
jax: 0.10.0
libtpu: 0.0.40
codegen_flags: <defaults>
</compile_context>

<pallas_src>
import math
import functools

import jax
import jax.numpy as jnp
from jax import lax
from jax.experimental import pallas as pl
from jax.experimental.pallas import tpu as pltpu


_NEG_INF = -1e30      # finite additive mask value (avoids inf-inf NaNs)
_LANE = 128           # last-dim multiple (lane width)
_SUBLANE = 8          # second-to-last-dim multiple (sublane width)


def _round_up(x, m):
    return ((x + m - 1) // m) * m


def _pad_axis(a, axis, target):
    pad = target - a.shape[axis]
    if pad == 0:
        return a
    widths = [(0, 0)] * a.ndim
    widths[axis] = (0, pad)
    return jnp.pad(a, widths)


def _decoder_stack_kernel(*refs, s_valid, scale, has_bias, emit_attn):
    """Fused decoder stack.  grid = (batch_tiles, n_layers); the layer axis is
    the trailing 'arbitrary' axis and x_freq / x_trend are carried across it in
    f32 VMEM scratch (accumulator pattern P3)."""
    it = iter(refs)
    x_ref = next(it)          # (BT, Lp, Dp)  compute dtype
    cross_ref = next(it)      # (BT, Sp, Dp)  compute dtype
    trend_ref = next(it)      # (BT, Lp, Dp)  compute dtype
    wq_ref = next(it); wk_ref = next(it); wv_ref = next(it)
    wo_ref = next(it); wt_ref = next(it)             # each (Dp, Dp)
    bias_ref = next(it) if has_bias else None        # (BT, Lp, Sp) f32
    xf_out = next(it)         # (BT, Lp, Dp)  out dtype
    xt_out = next(it)         # (BT, Lp, Dp)  out dtype
    attn_out = next(it) if emit_attn else None       # (BT, Lp, Sp) bf16
    xf_acc = next(it)         # (BT, Lp, Dp)  f32 carry
    xt_acc = next(it)         # (BT, Lp, Dp)  f32 carry

    layer = pl.program_id(1)
    n_layers = pl.num_programs(1)

    # Initialize the carried streams at the first layer of each batch tile.
    @pl.when(layer == 0)
    def _():
        xf_acc[...] = x_ref[...].astype(jnp.float32)
        xt_acc[...] = trend_ref[...].astype(jnp.float32)

    cdt = cross_ref.dtype                 # matmul operand dtype (e.g. bf16)
    BT, Lp, Dp = xf_acc.shape
    Sp = cross_ref.shape[1]

    xf = xf_acc[...]                      # f32 carry
    xt = xt_acc[...]

    # Q / K / V projections: flatten batch into the row axis so the MXU sees
    # M = BT*Lp (resp. BT*Sp) rows per matmul instead of Lp.
    x2 = xf.reshape(BT * Lp, Dp).astype(cdt)
    c2 = cross_ref[...].reshape(BT * Sp, Dp)

    q = jnp.dot(x2, wq_ref[...], preferred_element_type=jnp.float32)
    k = jnp.dot(c2, wk_ref[...], preferred_element_type=jnp.float32)
    v = jnp.dot(c2, wv_ref[...], preferred_element_type=jnp.float32)
    q = q.reshape(BT, Lp, Dp)
    k = k.reshape(BT, Sp, Dp)
    v = v.reshape(BT, Sp, Dp)

    # Scaled dot-product cross attention; contract D of both operands directly
    # (no explicit k.T, so no XLU transpose / extra VMEM temporary).
    s = jnp.einsum('bqd,bkd->bqk', q.astype(cdt), k.astype(cdt),
                   preferred_element_type=jnp.float32) * scale      # (BT,Lp,Sp)

    if has_bias:
        s = s + bias_ref[...]
    if s_valid < Sp:  # mask padded cross positions
        col = lax.broadcasted_iota(jnp.int32, (BT, Lp, Sp), 2)
        s = jnp.where(col < s_valid, s, _NEG_INF)

    m = jnp.max(s, axis=-1, keepdims=True)
    e = jnp.exp(s - m)
    denom = jnp.sum(e, axis=-1, keepdims=True)
    a = e * pl.reciprocal(denom, approx=True)       # EUP vrcp, VALU-free

    o = jnp.einsum('bqk,bkd->bqd', a.astype(cdt), v.astype(cdt),
                   preferred_element_type=jnp.float32)              # (BT,Lp,Dp)

    # Residual frequency update + trend accumulation.
    o2 = o.reshape(BT * Lp, Dp).astype(cdt)
    xf_new = xf + jnp.dot(o2, wo_ref[...],
                          preferred_element_type=jnp.float32).reshape(BT, Lp, Dp)
    xt_new = xt + jnp.dot(xf_new.reshape(BT * Lp, Dp).astype(cdt), wt_ref[...],
                          preferred_element_type=jnp.float32).reshape(BT, Lp, Dp)

    xf_acc[...] = xf_new
    xt_acc[...] = xt_new

    if emit_attn:
        attn_out[...] = a.astype(attn_out.dtype)

    @pl.when(layer == n_layers - 1)
    def _():
        xf_out[...] = xf_new.astype(xf_out.dtype)
        xt_out[...] = xt_new.astype(xt_out.dtype)


def decoder_forward(x, cross_freq, dec_trend, layer_weights,
                    x_mask=None, cross_mask=None, *,
                    compute_dtype=jnp.bfloat16, output_attention=True,
                    block_b=None, vmem_limit_bytes=None):
    """Faithful port of Decoder.forward with the per-layer Python loop fused
    into a single pallas_call.  Returns ([x_freq, x_trend], attn_list)."""
    # TODO(synk): x_mask (decoder self-attention mask) has no target in this
    # representative cross-attention layer; it is accepted but unused.
    del x_mask

    B, L, D = x.shape
    S = cross_freq.shape[1]
    n_layers = len(layer_weights)
    out_dtype = x.dtype
    scale = 1.0 / math.sqrt(D)   # single-head scaling, as in the previous port

    # Pad to TPU-friendly (sublane, lane) = (8, 128) multiples -> lane-dense
    # tiles and unmasked vector stores inside the kernel.
    Lp = _round_up(L, _SUBLANE)
    Sp = _round_up(S, _LANE)
    Dp = _round_up(D, _LANE)

    def pad_seq(a, rows, cols):
        return _pad_axis(_pad_axis(a, 1, rows), 2, cols).astype(compute_dtype)

    x_p = pad_seq(x, Lp, Dp)
    c_p = pad_seq(cross_freq, Sp, Dp)
    t_p = pad_seq(dec_trend, Lp, Dp)

    # Stack per-layer weights into (n_layers, Dp, Dp) so a single grid axis
    # streams them (fused layer loop).
    def stack_w(idx):
        w = jnp.stack([lw[idx] for lw in layer_weights], axis=0)
        return _pad_axis(_pad_axis(w, 1, Dp), 2, Dp).astype(compute_dtype)

    wq, wk, wv, wo, wt = (stack_w(i) for i in range(5))

    has_bias = cross_mask is not None
    inputs = [x_p, c_p, t_p, wq, wk, wv, wo, wt]
    if has_bias:
        cm = jnp.asarray(cross_mask)
        if cm.ndim == 2:
            cm = jnp.broadcast_to(cm[None], (B, L, S))
        if cm.dtype == jnp.bool_:
            bias = jnp.where(cm, 0.0, _NEG_INF).astype(jnp.float32)
        else:
            bias = cm.astype(jnp.float32)
        inputs.append(_pad_axis(_pad_axis(bias, 1, Lp), 2, Sp))

    # Batch tiling: feed the MXU ~128 rows per projection matmul when possible.
    if block_b is None:
        target = max(1, _LANE // Lp)
        block_b = 1
        for cand in range(1, B + 1):
            if B % cand == 0 and cand <= target:
                block_b = cand
    assert B % block_b == 0, "block_b must divide the batch"
    BT = block_b
    n_btiles = B // BT

    def seq_spec(rows, cols):
        return pl.BlockSpec((BT, rows, cols), lambda b, l: (b, 0, 0))

    w_spec = pl.BlockSpec((None, Dp, Dp), lambda b, l: (l, 0, 0))

    in_specs = [seq_spec(Lp, Dp), seq_spec(Sp, Dp), seq_spec(Lp, Dp),
                w_spec, w_spec, w_spec, w_spec, w_spec]
    if has_bias:
        in_specs.append(seq_spec(Lp, Sp))

    out_shape = [jax.ShapeDtypeStruct((B, Lp, Dp), out_dtype),
                 jax.ShapeDtypeStruct((B, Lp, Dp), out_dtype)]
    out_specs = [seq_spec(Lp, Dp), seq_spec(Lp, Dp)]
    if output_attention:
        # per-layer attention maps, bf16 to halve HBM write-back bytes
        out_shape.append(jax.ShapeDtypeStruct((n_layers, B, Lp, Sp), jnp.bfloat16))
        out_specs.append(pl.BlockSpec((None, BT, Lp, Sp), lambda b, l: (l, b, 0, 0)))

    kernel = functools.partial(_decoder_stack_kernel, s_valid=S, scale=scale,
                               has_bias=has_bias, emit_attn=output_attention)

    # TODO(synk): for very long cross sequences on v7x (64 MiB VMEM), tile Sp
    # with an online-softmax inner loop instead of keeping the full (Lp,Sp)
    # logits resident; not needed at these shapes.
    outs = pl.pallas_call(
        kernel,
        out_shape=out_shape,
        grid_spec=pltpu.PrefetchScalarGridSpec(
            num_scalar_prefetch=0,
            grid=(n_btiles, n_layers),        # carry (layer) axis last
            in_specs=in_specs,
            out_specs=out_specs,
            scratch_shapes=[pltpu.VMEM((BT, Lp, Dp), jnp.float32),
                            pltpu.VMEM((BT, Lp, Dp), jnp.float32)]),
        compiler_params=pltpu.CompilerParams(
            dimension_semantics=("parallel", "arbitrary"),
            vmem_limit_bytes=vmem_limit_bytes),
    )(*inputs)

    xf = outs[0][:, :L, :D]
    xt = outs[1][:, :L, :D]
    if output_attention:
        attn_stack = outs[2][:, :, :L, :S]
        attn = [attn_stack[i] for i in range(n_layers)]
    else:
        attn = [None] * n_layers
    return [xf, xt], attn


def _decoder_forward_reference(x, cross_freq, dec_trend, layer_weights,
                               compute_dtype=jnp.bfloat16):
    """Pure-JAX reference mirroring the kernel's dtype recipe (operands in
    compute_dtype, f32 accumulation, f32 carried streams)."""
    D = x.shape[-1]
    scale = 1.0 / math.sqrt(D)
    xf = x.astype(jnp.float32)
    xt = dec_trend.astype(jnp.float32)
    c = cross_freq.astype(compute_dtype)
    attn = []
    for (wq, wk, wv, wo, wt) in layer_weights:
        wq, wk, wv, wo, wt = (w.astype(compute_dtype) for w in (wq, wk, wv, wo, wt))
        q = jnp.einsum('bld,de->ble', xf.astype(compute_dtype), wq,
                       preferred_element_type=jnp.float32)
        k = jnp.einsum('bsd,de->bse', c, wk, preferred_element_type=jnp.float32)
        v = jnp.einsum('bsd,de->bse', c, wv, preferred_element_type=jnp.float32)
        s = jnp.einsum('bqd,bkd->bqk', q.astype(compute_dtype), k.astype(compute_dtype),
                       preferred_element_type=jnp.float32) * scale
        a = jax.nn.softmax(s, axis=-1)
        o = jnp.einsum('bqk,bkd->bqd', a.astype(compute_dtype), v.astype(compute_dtype),
                       preferred_element_type=jnp.float32)
        xf = xf + jnp.einsum('bld,de->ble', o.astype(compute_dtype), wo,
                             preferred_element_type=jnp.float32)
        xt = xt + jnp.einsum('bld,de->ble', xf.astype(compute_dtype), wt,
                             preferred_element_type=jnp.float32)
        attn.append(a)
    return [xf, xt], attn


def _init_layer_weights(key, d_model):
    keys = jax.random.split(key, 5)
    s = 1.0 / math.sqrt(d_model)
    return tuple(jax.random.normal(k, (d_model, d_model), dtype=jnp.float32) * s
                 for k in keys)


if __name__ == "__main__":
    B, L, S, D = 2, 8, 16, 32       # batch, dec seq, enc (cross) seq, d_model
    n_layers = 2

    root = jax.random.PRNGKey(0)
    kx, kc, kt, kw = jax.random.split(root, 4)

    x = jax.random.normal(kx, (B, L, D), dtype=jnp.float32)           # x
    cross_freq = jax.random.normal(kc, (B, S, D), dtype=jnp.float32)   # cross_freq
    dec_trend = jax.random.normal(kt, (B, L, D), dtype=jnp.float32)    # dec_trend

    layer_keys = jax.random.split(kw, n_layers)
    layer_weights = [_init_layer_weights(k, D) for k in layer_keys]

    (xf, xt), attn = decoder_forward(x, cross_freq, dec_trend, layer_weights,
                                     compute_dtype=jnp.bfloat16,
                                     output_attention=True)
    jax.block_until_ready(xf)
    jax.block_until_ready(xt)
    for a in attn:
        jax.block_until_ready(a)

    assert xf.shape == (B, L, D) and xt.shape == (B, L, D)
    assert len(attn) == n_layers and attn[0].shape == (B, L, S)

    # Numeric sanity check against a pure-JAX reference (same bf16/f32 recipe).
    (rf, rt), rattn = _decoder_forward_reference(x, cross_freq, dec_trend,
                                                 layer_weights,
                                                 compute_dtype=jnp.bfloat16)
    assert jnp.allclose(xf.astype(jnp.float32), rf, rtol=5e-2, atol=5e-2)
    assert jnp.allclose(xt.astype(jnp.float32), rt, rtol=5e-2, atol=5e-2)
    for a, ra in zip(attn, rattn):
        assert jnp.allclose(a.astype(jnp.float32), ra, rtol=5e-2, atol=5e-2)

    # Masked path: an all-True cross_mask must match the unmasked result.
    mask = jnp.ones((B, L, S), dtype=bool)
    (xf_m, xt_m), _ = decoder_forward(x, cross_freq, dec_trend, layer_weights,
                                      cross_mask=mask,
                                      compute_dtype=jnp.bfloat16,
                                      output_attention=False)
    assert jnp.allclose(xf_m, xf, rtol=1e-3, atol=1e-3)
    assert jnp.allclose(xt_m, xt, rtol=1e-3, atol=1e-3)

    print("KERNEL_OK")
</pallas_src>

<mosaic_0001>
module attributes {stable_mosaic.version = 11 : i64} {
  func.func @_decoder_stack_kernel(%arg0: i32, %arg1: i32, %arg2: memref<2x8x128xbf16, #tpu.memory_space<vmem>>, %arg3: memref<2x128x128xbf16, #tpu.memory_space<vmem>>, %arg4: memref<2x8x128xbf16, #tpu.memory_space<vmem>>, %arg5: memref<1x128x128xbf16, #tpu.memory_space<vmem>>, %arg6: memref<1x128x128xbf16, #tpu.memory_space<vmem>>, %arg7: memref<1x128x128xbf16, #tpu.memory_space<vmem>>, %arg8: memref<1x128x128xbf16, #tpu.memory_space<vmem>>, %arg9: memref<1x128x128xbf16, #tpu.memory_space<vmem>>, %arg10: memref<2x8x128xf32, #tpu.memory_space<vmem>>, %arg11: memref<2x8x128xf32, #tpu.memory_space<vmem>>, %arg12: memref<1x2x8x128xbf16, #tpu.memory_space<vmem>>, %arg13: memref<2x8x128xf32, #tpu.memory_space<vmem>>, %arg14: memref<2x8x128xf32, #tpu.memory_space<vmem>>) attributes {dimension_semantics = [#tpu.dimension_semantics<parallel>, #tpu.dimension_semantics<arbitrary>], iteration_bounds = array<i64: 1, 2>, scalar_prefetch = 0 : i64, scratch_operands = 2 : i64, tpu.core_type = #tpu.core_type<tc>, window_params = [{transform_indices = @transform_0, window_bounds = array<i64: 2, 8, 128>}, {transform_indices = @transform_1, window_bounds = array<i64: 2, 128, 128>}, {transform_indices = @transform_2, window_bounds = array<i64: 2, 8, 128>}, {transform_indices = @transform_3, window_bounds = array<i64: 1, 128, 128>}, {transform_indices = @transform_4, window_bounds = array<i64: 1, 128, 128>}, {transform_indices = @transform_5, window_bounds = array<i64: 1, 128, 128>}, {transform_indices = @transform_6, window_bounds = array<i64: 1, 128, 128>}, {transform_indices = @transform_7, window_bounds = array<i64: 1, 128, 128>}, {transform_indices = @transform_8, window_bounds = array<i64: 2, 8, 128>}, {transform_indices = @transform_9, window_bounds = array<i64: 2, 8, 128>}, {transform_indices = @transform_10, window_bounds = array<i64: 1, 2, 8, 128>}]} {
    %c0_i32 = arith.constant 0 : i32
    %0 = arith.cmpi eq, %arg1, %c0_i32 : i32
    %1 = arith.extui %0 : i1 to i32
    %c0_i32_0 = arith.constant 0 : i32
    %2 = arith.cmpi ne, %1, %c0_i32_0 : i32
    scf.if %2 {
      %c0_45 = arith.constant 0 : index
      %c0_46 = arith.constant 0 : index
      %c0_47 = arith.constant 0 : index
      %67 = vector.load %arg2[%c0_45, %c0_46, %c0_47] : memref<2x8x128xbf16, #tpu.memory_space<vmem>>, vector<2x8x128xbf16>
      %68 = arith.extf %67 : vector<2x8x128xbf16> to vector<2x8x128xf32>
      %c0_48 = arith.constant 0 : index
      %c0_49 = arith.constant 0 : index
      %c0_50 = arith.constant 0 : index
      %69 = vector.load %arg13[%c0_48, %c0_49, %c0_50] : memref<2x8x128xf32, #tpu.memory_space<vmem>>, vector<2x8x128xf32>
      tpu.vector_store %arg13[%c0_48, %c0_49, %c0_50], %68 {strides = array<i32>} : memref<2x8x128xf32, #tpu.memory_space<vmem>>, vector<2x8x128xf32>,
      %c0_51 = arith.constant 0 : index
      %c0_52 = arith.constant 0 : index
      %c0_53 = arith.constant 0 : index
      %70 = vector.load %arg4[%c0_51, %c0_52, %c0_53] : memref<2x8x128xbf16, #tpu.memory_space<vmem>>, vector<2x8x128xbf16>
      %71 = arith.extf %70 : vector<2x8x128xbf16> to vector<2x8x128xf32>
      %c0_54 = arith.constant 0 : index
      %c0_55 = arith.constant 0 : index
      %c0_56 = arith.constant 0 : index
      %72 = vector.load %arg14[%c0_54, %c0_55, %c0_56] : memref<2x8x128xf32, #tpu.memory_space<vmem>>, vector<2x8x128xf32>
      tpu.vector_store %arg14[%c0_54, %c0_55, %c0_56], %71 {strides = array<i32>} : memref<2x8x128xf32, #tpu.memory_space<vmem>>, vector<2x8x128xf32>,
    } else {
    }
    %c0 = arith.constant 0 : index
    %c0_1 = arith.constant 0 : index
    %c0_2 = arith.constant 0 : index
    %3 = vector.load %arg13[%c0, %c0_1, %c0_2] : memref<2x8x128xf32, #tpu.memory_space<vmem>>, vector<2x8x128xf32>
    %c0_3 = arith.constant 0 : index
    %c0_4 = arith.constant 0 : index
    %c0_5 = arith.constant 0 : index
    %4 = vector.load %arg14[%c0_3, %c0_4, %c0_5] : memref<2x8x128xf32, #tpu.memory_space<vmem>>, vector<2x8x128xf32>
    %5 = vector.shape_cast %3 : vector<2x8x128xf32> to vector<16x128xf32>
    %6 = arith.truncf %5 : vector<16x128xf32> to vector<16x128xbf16>
    %c0_6 = arith.constant 0 : index
    %c0_7 = arith.constant 0 : index
    %c0_8 = arith.constant 0 : index
    %7 = vector.load %arg3[%c0_6, %c0_7, %c0_8] : memref<2x128x128xbf16, #tpu.memory_space<vmem>>, vector<2x128x128xbf16>
    %8 = vector.shape_cast %7 : vector<2x128x128xbf16> to vector<256x128xbf16>
    %c0_9 = arith.constant 0 : index
    %c0_10 = arith.constant 0 : index
    %c0_11 = arith.constant 0 : index
    %9 = vector.load %arg5[%c0_9, %c0_10, %c0_11] : memref<1x128x128xbf16, #tpu.memory_space<vmem>>, vector<1x128x128xbf16>
    %10 = vector.shape_cast %9 : vector<1x128x128xbf16> to vector<128x128xbf16>
    %cst = arith.constant dense<0.000000e+00> : vector<16x128xf32>
    %11 = tpu.matmul %6, %10, %cst {dimension_numbers = #tpu.dot_dimension_numbers<[1], [0], [0], [1], [0, 0, 1, 1], [], []>} : vector<16x128xbf16>, vector<128x128xbf16>, vector<16x128xf32> -> vector<16x128xf32>
    %c0_12 = arith.constant 0 : index
    %c0_13 = arith.constant 0 : index
    %c0_14 = arith.constant 0 : index
    %12 = vector.load %arg6[%c0_12, %c0_13, %c0_14] : memref<1x128x128xbf16, #tpu.memory_space<vmem>>, vector<1x128x128xbf16>
    %13 = vector.shape_cast %12 : vector<1x128x128xbf16> to vector<128x128xbf16>
    %cst_15 = arith.constant dense<0.000000e+00> : vector<256x128xf32>
    %14 = tpu.matmul %8, %13, %cst_15 {dimension_numbers = #tpu.dot_dimension_numbers<[1], [0], [0], [1], [0, 0, 1, 1], [], []>} : vector<256x128xbf16>, vector<128x128xbf16>, vector<256x128xf32> -> vector<256x128xf32>
    %c0_16 = arith.constant 0 : index
    %c0_17 = arith.constant 0 : index
    %c0_18 = arith.constant 0 : index
    %15 = vector.load %arg7[%c0_16, %c0_17, %c0_18] : memref<1x128x128xbf16, #tpu.memory_space<vmem>>, vector<1x128x128xbf16>
    %16 = vector.shape_cast %15 : vector<1x128x128xbf16> to vector<128x128xbf16>
    %cst_19 = arith.constant dense<0.000000e+00> : vector<256x128xf32>
    %17 = tpu.matmul %8, %16, %cst_19 {dimension_numbers = #tpu.dot_dimension_numbers<[1], [0], [0], [1], [0, 0, 1, 1], [], []>} : vector<256x128xbf16>, vector<128x128xbf16>, vector<256x128xf32> -> vector<256x128xf32>
    %18 = vector.shape_cast %11 : vector<16x128xf32> to vector<2x8x128xf32>
    %19 = vector.shape_cast %14 : vector<256x128xf32> to vector<2x128x128xf32>
    %20 = vector.shape_cast %17 : vector<256x128xf32> to vector<2x128x128xf32>
    %21 = arith.truncf %18 : vector<2x8x128xf32> to vector<2x8x128xbf16>
    %22 = arith.truncf %19 : vector<2x128x128xf32> to vector<2x128x128xbf16>
    "tpu.trace_start"() <{level = 10 : i32, message = "bqd,bkd->bqk"}> : () -> ()
    %cst_20 = arith.constant dense<0.000000e+00> : vector<2x8x128xf32>
    %23 = tpu.matmul %21, %22, %cst_20 {dimension_numbers = #tpu.dot_dimension_numbers<[2], [2], [1], [1], [0, 0, 0, 1, 1, 1], [0], [0]>} : vector<2x8x128xbf16>, vector<2x128x128xbf16>, vector<2x8x128xf32> -> vector<2x8x128xf32>
    "tpu.trace_stop"() : () -> ()
    %cst_21 = arith.constant 0.176776692 : f32
    %24 = vector.broadcast %cst_21 : f32 to vector<2x8x128xf32>
    %25 = arith.mulf %23, %24 : vector<2x8x128xf32>
    %26 = tpu.iota {dimensions = array<i32: 2>} : vector<2x8x128xi32>
    %c16_i32 = arith.constant 16 : i32
    %27 = vector.broadcast %c16_i32 : i32 to vector<2x8x128xi32>
    %28 = arith.cmpi slt, %26, %27 : vector<2x8x128xi32>
    %cst_22 = arith.constant -1.000000e+30 : f32
    %29 = vector.broadcast %cst_22 : f32 to vector<2x8x128xf32>
    %30 = arith.select %28, %25, %29 : vector<2x8x128xi1>, vector<2x8x128xf32>
    %cst_23 = arith.constant dense<0xFF800000> : vector<2x8xf32>
    %31 = vector.multi_reduction <maximumf>, %30, %cst_23 [2] : vector<2x8x128xf32> to vector<2x8xf32>
    %32 = vector.shape_cast %31 : vector<2x8xf32> to vector<2x8x1xf32>
    %33 = vector.broadcast %32 : vector<2x8x1xf32> to vector<2x8x128xf32>
    %34 = arith.subf %30, %33 : vector<2x8x128xf32>
    %35 = math.exp %34 : vector<2x8x128xf32>
    %cst_24 = arith.constant dense<0.000000e+00> : vector<2x8xf32>
    %36 = vector.multi_reduction <add>, %35, %cst_24 [2] : vector<2x8x128xf32> to vector<2x8xf32>
    %37 = vector.shape_cast %36 : vector<2x8xf32> to vector<2x8x1xf32>
    %38 = tpu.reciprocal %37 {approx = true} : vector<2x8x1xf32> -> vector<2x8x1xf32>
    %39 = vector.broadcast %38 : vector<2x8x1xf32> to vector<2x8x128xf32>
    %40 = arith.mulf %35, %39 : vector<2x8x128xf32>
    %41 = arith.truncf %40 : vector<2x8x128xf32> to vector<2x8x128xbf16>
    %42 = arith.truncf %20 : vector<2x128x128xf32> to vector<2x128x128xbf16>
    "tpu.trace_start"() <{level = 10 : i32, message = "bqk,bkd->bqd"}> : () -> ()
    %cst_25 = arith.constant dense<0.000000e+00> : vector<2x8x128xf32>
    %43 = tpu.matmul %41, %42, %cst_25 {dimension_numbers = #tpu.dot_dimension_numbers<[2], [1], [1], [2], [0, 0, 0, 1, 1, 2], [0], [0]>} : vector<2x8x128xbf16>, vector<2x128x128xbf16>, vector<2x8x128xf32> -> vector<2x8x128xf32>
    "tpu.trace_stop"() : () -> ()
    %44 = vector.shape_cast %43 : vector<2x8x128xf32> to vector<16x128xf32>
    %45 = arith.truncf %44 : vector<16x128xf32> to vector<16x128xbf16>
    %c0_26 = arith.constant 0 : index
    %c0_27 = arith.constant 0 : index
    %c0_28 = arith.constant 0 : index
    %46 = vector.load %arg8[%c0_26, %c0_27, %c0_28] : memref<1x128x128xbf16, #tpu.memory_space<vmem>>, vector<1x128x128xbf16>
    %47 = vector.shape_cast %46 : vector<1x128x128xbf16> to vector<128x128xbf16>
    %cst_29 = arith.constant dense<0.000000e+00> : vector<16x128xf32>
    %48 = tpu.matmul %45, %47, %cst_29 {dimension_numbers = #tpu.dot_dimension_numbers<[1], [0], [0], [1], [0, 0, 1, 1], [], []>} : vector<16x128xbf16>, vector<128x128xbf16>, vector<16x128xf32> -> vector<16x128xf32>
    %49 = vector.shape_cast %48 : vector<16x128xf32> to vector<2x8x128xf32>
    %50 = arith.addf %3, %49 : vector<2x8x128xf32>
    %51 = vector.shape_cast %50 : vector<2x8x128xf32> to vector<16x128xf32>
    %52 = arith.truncf %51 : vector<16x128xf32> to vector<16x128xbf16>
    %c0_30 = arith.constant 0 : index
    %c0_31 = arith.constant 0 : index
    %c0_32 = arith.constant 0 : index
    %53 = vector.load %arg9[%c0_30, %c0_31, %c0_32] : memref<1x128x128xbf16, #tpu.memory_space<vmem>>, vector<1x128x128xbf16>
    %54 = vector.shape_cast %53 : vector<1x128x128xbf16> to vector<128x128xbf16>
    %cst_33 = arith.constant dense<0.000000e+00> : vector<16x128xf32>
    %55 = tpu.matmul %52, %54, %cst_33 {dimension_numbers = #tpu.dot_dimension_numbers<[1], [0], [0], [1], [0, 0, 1, 1], [], []>} : vector<16x128xbf16>, vector<128x128xbf16>, vector<16x128xf32> -> vector<16x128xf32>
    %56 = vector.shape_cast %55 : vector<16x128xf32> to vector<2x8x128xf32>
    %57 = arith.addf %4, %56 : vector<2x8x128xf32>
    %c0_34 = arith.constant 0 : index
    %c0_35 = arith.constant 0 : index
    %c0_36 = arith.constant 0 : index
    %58 = vector.load %arg13[%c0_34, %c0_35, %c0_36] : memref<2x8x128xf32, #tpu.memory_space<vmem>>, vector<2x8x128xf32>
    tpu.vector_store %arg13[%c0_34, %c0_35, %c0_36], %50 {strides = array<i32>} : memref<2x8x128xf32, #tpu.memory_space<vmem>>, vector<2x8x128xf32>,
    %c0_37 = arith.constant 0 : index
    %c0_38 = arith.constant 0 : index
    %c0_39 = arith.constant 0 : index
    %59 = vector.load %arg14[%c0_37, %c0_38, %c0_39] : memref<2x8x128xf32, #tpu.memory_space<vmem>>, vector<2x8x128xf32>
    tpu.vector_store %arg14[%c0_37, %c0_38, %c0_39], %57 {strides = array<i32>} : memref<2x8x128xf32, #tpu.memory_space<vmem>>, vector<2x8x128xf32>,
    %60 = arith.truncf %40 : vector<2x8x128xf32> to vector<2x8x128xbf16>
    %c0_40 = arith.constant 0 : index
    %c0_41 = arith.constant 0 : index
    %c0_42 = arith.constant 0 : index
    %c0_43 = arith.constant 0 : index
    %61 = vector.load %arg12[%c0_40, %c0_41, %c0_42, %c0_43] : memref<1x2x8x128xbf16, #tpu.memory_space<vmem>>, vector<1x2x8x128xbf16>
    %62 = vector.shape_cast %61 : vector<1x2x8x128xbf16> to vector<2x8x128xbf16>
    %63 = vector.shape_cast %60 : vector<2x8x128xbf16> to vector<1x2x8x128xbf16>
    tpu.vector_store %arg12[%c0_40, %c0_41, %c0_42, %c0_43], %63 {strides = array<i32>} : memref<1x2x8x128xbf16, #tpu.memory_space<vmem>>, vector<1x2x8x128xbf16>,
    %c1_i32 = arith.constant 1 : i32
    %64 = arith.cmpi eq, %arg1, %c1_i32 : i32
    %65 = arith.extui %64 : i1 to i32
    %c0_i32_44 = arith.constant 0 : i32
    %66 = arith.cmpi ne, %65, %c0_i32_44 : i32
    scf.if %66 {
      %c0_45 = arith.constant 0 : index
      %c0_46 = arith.constant 0 : index
      %c0_47 = arith.constant 0 : index
      %67 = vector.load %arg10[%c0_45, %c0_46, %c0_47] : memref<2x8x128xf32, #tpu.memory_space<vmem>>, vector<2x8x128xf32>
      tpu.vector_store %arg10[%c0_45, %c0_46, %c0_47], %50 {strides = array<i32>} : memref<2x8x128xf32, #tpu.memory_space<vmem>>, vector<2x8x128xf32>,
      %c0_48 = arith.constant 0 : index
      %c0_49 = arith.constant 0 : index
      %c0_50 = arith.constant 0 : index
      %68 = vector.load %arg11[%c0_48, %c0_49, %c0_50] : memref<2x8x128xf32, #tpu.memory_space<vmem>>, vector<2x8x128xf32>
      tpu.vector_store %arg11[%c0_48, %c0_49, %c0_50], %57 {strides = array<i32>} : memref<2x8x128xf32, #tpu.memory_space<vmem>>, vector<2x8x128xf32>,
    } else {
    }
    return
  }
  func.func @transform_0(%arg0: i32, %arg1: i32) -> (i32, i32, i32) {
    %c0_i32 = arith.constant 0 : i32
    %c0_i32_0 = arith.constant 0 : i32
    %c0_i32_1 = arith.constant 0 : i32
    return %arg0, %c0_i32, %c0_i32_0 : i32, i32, i32
  }
  func.func @transform_1(%arg0: i32, %arg1: i32) -> (i32, i32, i32) {
    %c0_i32 = arith.constant 0 : i32
    %c0_i32_0 = arith.constant 0 : i32
    %c0_i32_1 = arith.constant 0 : i32
    return %arg0, %c0_i32, %c0_i32_0 : i32, i32, i32
  }
  func.func @transform_2(%arg0: i32, %arg1: i32) -> (i32, i32, i32) {
    %c0_i32 = arith.constant 0 : i32
    %c0_i32_0 = arith.constant 0 : i32
    %c0_i32_1 = arith.constant 0 : i32
    return %arg0, %c0_i32, %c0_i32_0 : i32, i32, i32
  }
  func.func @transform_3(%arg0: i32, %arg1: i32) -> (i32, i32, i32) {
    %c0_i32 = arith.constant 0 : i32
    %c0_i32_0 = arith.constant 0 : i32
    %c0_i32_1 = arith.constant 0 : i32
    return %arg1, %c0_i32, %c0_i32_0 : i32, i32, i32
  }
  func.func @transform_4(%arg0: i32, %arg1: i32) -> (i32, i32, i32) {
    %c0_i32 = arith.constant 0 : i32
    %c0_i32_0 = arith.constant 0 : i32
    %c0_i32_1 = arith.constant 0 : i32
    return %arg1, %c0_i32, %c0_i32_0 : i32, i32, i32
  }
  func.func @transform_5(%arg0: i32, %arg1: i32) -> (i32, i32, i32) {
    %c0_i32 = arith.constant 0 : i32
    %c0_i32_0 = arith.constant 0 : i32
    %c0_i32_1 = arith.constant 0 : i32
    return %arg1, %c0_i32, %c0_i32_0 : i32, i32, i32
  }
  func.func @transform_6(%arg0: i32, %arg1: i32) -> (i32, i32, i32) {
    %c0_i32 = arith.constant 0 : i32
    %c0_i32_0 = arith.constant 0 : i32
    %c0_i32_1 = arith.constant 0 : i32
    return %arg1, %c0_i32, %c0_i32_0 : i32, i32, i32
  }
  func.func @transform_7(%arg0: i32, %arg1: i32) -> (i32, i32, i32) {
    %c0_i32 = arith.constant 0 : i32
    %c0_i32_0 = arith.constant 0 : i32
    %c0_i32_1 = arith.constant 0 : i32
    return %arg1, %c0_i32, %c0_i32_0 : i32, i32, i32
  }
  func.func @transform_8(%arg0: i32, %arg1: i32) -> (i32, i32, i32) {
    %c0_i32 = arith.constant 0 : i32
    %c0_i32_0 = arith.constant 0 : i32
    %c0_i32_1 = arith.constant 0 : i32
    return %arg0, %c0_i32, %c0_i32_0 : i32, i32, i32
  }
  func.func @transform_9(%arg0: i32, %arg1: i32) -> (i32, i32, i32) {
    %c0_i32 = arith.constant 0 : i32
    %c0_i32_0 = arith.constant 0 : i32
    %c0_i32_1 = arith.constant 0 : i32
    return %arg0, %c0_i32, %c0_i32_0 : i32, i32, i32
  }
  func.func @transform_10(%arg0: i32, %arg1: i32) -> (i32, i32, i32, i32) {
    %c0_i32 = arith.constant 0 : i32
    %c0_i32_0 = arith.constant 0 : i32
    %c0_i32_1 = arith.constant 0 : i32
    return %arg1, %arg0, %c0_i32, %c0_i32_0 : i32, i32, i32, i32
  }
}

</mosaic_0001>

<bundles_post_ra>
// kernel: tpu_custom_call.1
= control target key start
LH: loop header
LB: loop body
LE: loop exit
PB: predicated region body
PF: predicated region fallthrough
CT: control target
= control target key end

     0   :  { %s3732_s0 = inlined_call_operand.hbm [shape: bf16[2,8,128], index: 0, kind: input, shape index: {}]   ;;  %s3733_s1 = inlined_call_operand.hbm [shape: bf16[2,128,128], index: 1, kind: input, shape index: {}]   ;;  %s3734_s2 = inlined_call_operand.hbm [shape: bf16[2,8,128], index: 2, kind: input, shape index: {}]   ;;  %s3735_s3 = inlined_call_operand.hbm [shape: bf16[2,128,128], index: 3, kind: input, shape index: {}]   ;;  %s3736_s4 = inlined_call_operand.hbm [shape: bf16[2,128,128], index: 4, kind: input, shape index: {}]   ;;  %s3737_s5 = inlined_call_operand.hbm [shape: bf16[2,128,128], index: 5, kind: input, shape index: {}]   ;;  %s3738_s6 = inlined_call_operand.hbm [shape: bf16[2,128,128], index: 6, kind: input, shape index: {}]   ;;  %s3739_s7 = inlined_call_operand.hbm [shape: bf16[2,128,128], index: 7, kind: input, shape index: {}]   ;;  %s3740_s8 = inlined_call_operand.hbm [shape: f32[2,8,128], index: 8, kind: output, shape index: {0}]   ;;  %s3741_s9 = inlined_call_operand.hbm [shape: f32[2,8,128], index: 9, kind: output, shape index: {1}]   ;;  %s3742_s10 = inlined_call_operand.hbm [shape: bf16[2,2,8,128], index: 10, kind: output, shape index: {2}]  }
   0x1   :  { %3760 = sst [smem:[#allocation36_spill]] %s3732_s0 }
   0x2   :  { %3761 = sst [smem:[#allocation37_spill]] %s3733_s1 }
   0x3   :  { %3762 = sst [smem:[#allocation38_spill]] %s3734_s2 }
   0x4   :  { %3763 = sst [smem:[#allocation39_spill]] %s3735_s3 }
   0x5   :  { %3764 = sst [smem:[#allocation40_spill]] %s3741_s9 }
   0x6   :  { %3765 = sst [smem:[#allocation41_spill]] %s3742_s10 }
   0x7   :  { %16 = vsyncpa [#allocation5], 0 }
   0x8   :  { %17 = vsyncpa [#allocation8], 0 }
   0x9   :  { %18 = vsyncpa [#allocation11], 0 }
   0xa   :  { %20 = vsyncpa [#allocation11 + $0x1], 0 }
   0xb   :  { %21 = vsyncpa [#allocation14], 0 }
   0xc   :  { %23 = vsyncpa [#allocation14 + $0x1], 0 }
   0xd   :  { %24 = vsyncpa [#allocation17], 0 }
   0xe   :  { %26 = vsyncpa [#allocation17 + $0x1], 0 }
   0xf   :  { %27 = vsyncpa [#allocation6], 0 }
  0x10   :  { %28 = vsyncpa [#allocation20], 0  ;;  %s3171_s13 = smov 0   ;;  %s3173_s14 = smov 0  }
  0x11   :  { %s3175_s15 = smov 0   ;;  %s3177_s16 = smov 0  }
  0x12   :  { %s3179_s17 = smov 0   ;;  %s3181_s18 = smov 0  }
  0x13 LB: > { %3766 = sst [smem:[#allocation30_spill]] %s3091_s17  ;;  %s3200_s19 = sadd.s32 4294967295, %s3095_s18   ;;  %s3095_s18 = sphi %s3181_s18, %s34_s18   ;;  %s3091_s17 = sphi %s3179_s17, %s3816_s17   ;;  %s3087_s16 = sphi %s3177_s16, %s3815_s16   ;;  %s3083_s15 = sphi %s3175_s15, %s3819_s15   ;;  %s3079_s14 = sphi %s3173_s14, %s3818_s14   ;;  %s3075_s13 = sphi %s3171_s13, %s3817_s13  }
  0x14   : > { %3767 = sst [smem:[#allocation31_spill]] %s3095_s18  ;;  %s3745_s20 = sadd.s32 4294967294, %s3095_s18  }
  0x15   : > { %p138_p0 = scmp.ne.s32.totalorder %s3083_s15, %s3079_s14  ;;  %p139_p1 = scmp.eq.s32.totalorder %s3095_s18, 0 }
  0x16   : > { %p144_p2 = scmp.ne.s32.totalorder %s3079_s14, %s3075_s13  ;;  %p3744_p3 = scmp.eq.s32.totalorder %s3200_s19, 0 }
  0x17   : > { %p3743_p4 = scmp.eq.s32.totalorder %s3200_s19, 1  ;;  %p3210_p5 = por %p139_p1, %p138_p0 }
  0x18   : > { %p332_p6 = scmp.eq.s32.totalorder %s3745_s20, 1  ;;  %p3218_p7 = por %p3744_p3, %p144_p2 }
  0x19   : > { %p3224_p8 = por %p3743_p4, %p138_p0  ;;  %p2063_p10 = scmp.ge.s32.totalorder %s3095_s18, 1 }
  0x1a   : > { %p3228_p9 = por %p332_p6, %p144_p2  ;;  %p339_p11 = scmp.lt.s32.totalorder %s3095_s18, 3 }
  0x1b   : > { %s3770_s24 = scalar_select %p3224_p8, 1, 0 }
  0x1c   : > { %s3772_s25 = scalar_select %p3228_p9, 1, 0 }
  0x1d   : > { %3771 = sst [smem:[#allocation32_spill]] %s3770_s24  ;;  %p3234_p12 = pnand %p2063_p10, %p339_p11 }
  0x1e   : > { %3773 = sst [smem:[#allocation33_spill]] %s3772_s25  ;;  %s3097_s27 = smov [#allocation7]  }
  0x1f   : > { %s371_s28 = sshll.u32 %s3097_s27, 4  ;;  %p2558_p1 = pneg %p3234_p12  ;;  %s372_s28 = int_to_ptr.vmem [resolvable:$true] %s371_s28 }
  0x20   : > { %s43_s30 = sadd.s32 1, %s3091_s17  ;;  %s2736_s13 = scalar_lea.vmem %s372_s28, 2048 }
  0x21   : > { %p3244_p4 = pnand %p2558_p1, %p3744_p3  ;;  %p3250_p2 = scmp.ge.s32.totalorder %s43_s30, 2 }
  0x22   : > { %p2737_p10 = scmp.ne.s32.totalorder %s372_s28, %s2736_s13  ;;  %p2744_p1 = scmp.lt.s32.totalorder %s372_s28, %s372_s28 }
  0x23   : > { %p2727_p6 = pneg %p3244_p4  ;;  %p2745_p3 = scmp.lt.s32.totalorder %s2736_s13, %s2736_s13 }
  0x25   : > { %p2739_p11 = pnand %p2737_p10, %p2727_p6  ;;  %p2746_p0 = por %p2745_p3, %p2744_p1 }
  0x27   : > { %p2740_p13 = pneg %p2739_p11 }
  0x29   : > { %p2747_p9 = pnand %p2746_p0, %p2740_p13 }
  0x2b   : > { %2750 = shalt.err (!%p2747_p9)
}
  0x2c   : > { %s3750_s27 = smov 64   ;;  %s3752_s20 = smov 4  }
  0x2d   : > { %s3777_s1 = sld [smem:[#allocation37_spill]]  ;;  %s3821_s30 = smov (%p3250_p2, %s43_s30), 0 }
  0x2e   : > { %3778 = sst [smem:[#allocation34_spill]] %s3821_s30  ;;  %s3754_s21 = sand.u32 1, %s3083_s15  }
  0x2f   : > { %s128_s25 = ssub.s32 %s3091_s17, %s3821_s30  ;;  %s3276_s24 = sshll.u32 %s3754_s21, 6 }
  0x30   : > { %p129_p3 = scmp.eq.s32.totalorder %s128_s25, 0  ;;  %s3279_s9 = sshll.u32 %s3091_s17, 10 }
  0x31   : > { %s405_s10 = scalar_lea.vmem [#allocation10], %s3276_s24  ;;  %s3781_s3 = sld [smem:[#allocation39_spill]] }
  0x32   : > { %s412_s11 = sshll.u32 %s405_s10, 4  ;;  %p3782_p9 = scmp.lt.s32.totalorder %s3095_s18, 2  ;;  %s413_s11 = int_to_ptr.vmem [resolvable:$true] %s412_s11 }
  0x33   : > { %2564 = dma.hbm_to_vmem [thread:$0]  (!%p3244_p4), %s3777_s1, 2048, %s372_s28, [#allocation8], %s3750_s27, %s3750_s27, %s3752_s20  }
  0x34   : > { %s3779_s28 = sadd.s32 1, %s3083_s15  ;;  %p3295_p13 = pnand %p3782_p9, %p3210_p5 }
  0x35   : > { %s3285_s12 = scalar_select %p129_p3, %s3083_s15, %s3779_s28  }
  0x36   : > { %s447_s10 = scalar_lea.vmem [#allocation13], %s3276_s24  ;;  %s3784_s28 = sand.u32 1, %s3095_s18  }
  0x37   : > { %3780 = sst [smem:[#allocation35_spill]] %s3285_s12  ;;  %s411_s20 = scalar_lea.hbm %s3781_s3, %s3279_s9 }
  0x38   : > { %s454_s17 = sshll.u32 %s447_s10, 4  ;;  %s3306_s12 = scalar_lea.sflag [#allocation11], %s3784_s28  ;;  %s455_s17 = int_to_ptr.vmem [resolvable:$true] %s454_s17 }
  0x39   : > { %p3310_p0 = pneg %p3295_p13  ;;  %s2764_s22 = scalar_lea.vmem %s413_s11, 1024 }
  0x3a   : > { %p2765_p5 = scmp.ne.s32.totalorder %s413_s11, %s2764_s22  ;;  %s3100_s13 = smov [#allocation10]  }
  0x3b   : > { %s2769_s1 = sshll.u32 %s3100_s13, 4  ;;  %s2770_s1 = int_to_ptr.vmem [resolvable:$false] %s2769_s1 }
  0x3c   : > { %p2767_p2 = pnand %p2765_p5, %p3310_p0  ;;  %s2771_s25 = scalar_lea.vmem %s2770_s1, 2048 }
  0x3d   : > { %p2772_p11 = scmp.lt.s32.totalorder %s413_s11, %s2770_s1  ;;  %p2773_p1 = scmp.lt.s32.totalorder %s2771_s25, %s2764_s22 }
  0x3e   : > { %p2768_p10 = pneg %p2767_p2 }
  0x3f   : > { %p2774_p3 = por %p2773_p1, %p2772_p11 }
  0x41   : > { %p2775_p9 = pnand %p2774_p3, %p2768_p10 }
  0x43   : > { %2778 = shalt.err (!%p2775_p9)
}
  0x44   : > { %s3786_s10 = smov 4   ;;  %s3787_s28 = smov 64  }
  0x45   : > { %2571 = dma.hbm_to_vmem [thread:$0]  (!%p3295_p13), %s411_s20, 1024, %s413_s11, %s3306_s12, %s3787_s28, %s3787_s28, %s3786_s10  }
  0x46   : > { %s3788_s30 = sand.u32 1, %s3095_s18   ;;  %s2792_s13 = scalar_lea.vmem %s455_s17, 1024 }
  0x47   : > { %s3324_s3 = scalar_lea.sflag [#allocation14], %s3788_s30  ;;  %p2793_p5 = scmp.ne.s32.totalorder %s455_s17, %s2792_s13 }
  0x48   : > { %s3101_s22 = smov [#allocation13]  }
  0x49   : > { %p2795_p2 = pnand %p2793_p5, %p3310_p0  ;;  %s2797_s1 = sshll.u32 %s3101_s22, 4  ;;  %s2798_s1 = int_to_ptr.vmem [resolvable:$false] %s2797_s1 }
  0x4a   : > { %s2799_s25 = scalar_lea.vmem %s2798_s1, 2048  ;;  %p2800_p10 = scmp.lt.s32.totalorder %s455_s17, %s2798_s1 }
  0x4b   : > { %p2796_p11 = pneg %p2795_p2  ;;  %p2801_p1 = scmp.lt.s32.totalorder %s2799_s25, %s2792_s13 }
  0x4d   : > { %p2802_p3 = por %p2801_p1, %p2800_p10 }
  0x4f   : > { %p2803_p9 = pnand %p2802_p3, %p2796_p11 }
  0x51   : > { %2806 = shalt.err (!%p2803_p9)
}
  0x52   : > { %s3789_s11 = scalar_lea.hbm %s3737_s5, %s3279_s9  ;;  %s3102_s22 = smov [#allocation4]  }
  0x53   : > { %2577 = dma.hbm_to_vmem [thread:$0]  (!%p3295_p13), %s3789_s11, 1024, %s455_s17, %s3324_s3, %s3787_s28, %s3787_s28, %s3786_s10  }
  0x54   : > { %s354_s18 = sshll.u32 %s3102_s22, 4  ;;  %s3103_s13 = smov [#allocation9]   ;;  %s355_s18 = int_to_ptr.vmem [resolvable:$true] %s354_s18 }
  0x55   : > { %s387_s1 = sshll.u32 %s3103_s13, 4  ;;  %s2818_s25 = scalar_lea.vmem %s355_s18, 128  ;;  %s388_s1 = int_to_ptr.vmem [resolvable:$true] %s387_s1 }
  0x56   : > { %p2819_p5 = scmp.ne.s32.totalorder %s355_s18, %s2818_s25  ;;  %p2826_p10 = scmp.lt.s32.totalorder %s355_s18, %s355_s18 }
  0x57   : > { %p2827_p1 = scmp.lt.s32.totalorder %s2818_s25, %s2818_s25 }
  0x58   : > { %p2821_p2 = pnand %p2819_p5, %p2727_p6 }
  0x59   : > { %p2828_p3 = por %p2827_p1, %p2826_p10 }
  0x5a   : > { %p2822_p11 = pneg %p2821_p2 }
  0x5c   : > { %p2829_p9 = pnand %p2828_p3, %p2822_p11 }
  0x5e   : > { %2832 = shalt.err (!%p2829_p9)
}
  0x5f   : > { %s3790_s0 = sld [smem:[#allocation36_spill]]  ;;  %s2844_s30 = scalar_lea.vmem %s388_s1, 128 }
  0x60   : > { %p2845_p8 = scmp.ne.s32.totalorder %s388_s1, %s2844_s30  ;;  %p2852_p10 = scmp.lt.s32.totalorder %s388_s1, %s388_s1 }
  0x61   : > { %p2853_p11 = scmp.lt.s32.totalorder %s2844_s30, %s2844_s30 }
  0x62   : > { %p2847_p5 = pnand %p2845_p8, %p2727_p6 }
  0x63   : > { %p2854_p1 = por %p2853_p11, %p2852_p10 }
  0x64   : > { %p2848_p2 = pneg %p2847_p5 }
  0x65   : > { %2561 = dma.hbm_to_vmem [thread:$0]  (!%p3244_p4), %s3790_s0, 128, %s355_s18, [#allocation5], %s3787_s28, %s3787_s28, %s3786_s10  }
  0x66   : > { %p2855_p3 = pnand %p2854_p1, %p2848_p2 }
  0x68   : > { %2858 = shalt.err (!%p2855_p3)
}
  0x69   : > { %s3791_s2 = sld [smem:[#allocation38_spill]]  ;;  %s432_s25 = scalar_lea.hbm %s3736_s4, %s3279_s9 }
  0x6a   : > { %s426_s17 = scalar_lea.vmem [#allocation12], %s3276_s24  ;;  %s3104_s29 = smov [#allocation12]  }
  0x6b   : > { %s433_s20 = sshll.u32 %s426_s17, 4  ;;  %s2877_s0 = sshll.u32 %s3104_s29, 4  ;;  %s434_s20 = int_to_ptr.vmem [resolvable:$true] %s433_s20  ;;  %s2878_s0 = int_to_ptr.vmem [resolvable:$false] %s2877_s0 }
  0x6c   : > { %s2872_s30 = scalar_lea.vmem %s434_s20, 1024  ;;  %s2879_s11 = scalar_lea.vmem %s2878_s0, 2048 }
  0x6d   : > { %p2873_p8 = scmp.ne.s32.totalorder %s434_s20, %s2872_s30  ;;  %p2880_p5 = scmp.lt.s32.totalorder %s434_s20, %s2878_s0 }
  0x6e   : > { %p2881_p2 = scmp.lt.s32.totalorder %s2879_s11, %s2872_s30 }
  0x6f   : > { %2567 = dma.hbm_to_vmem [thread:$0]  (!%p3244_p4), %s3791_s2, 128, %s388_s1, [#allocation8], %s3787_s28, %s3787_s28, %s3786_s10  }
  0x70   : > { %p2875_p6 = pnand %p2873_p8, %p3310_p0  ;;  %p2882_p10 = por %p2881_p2, %p2880_p5 }
  0x72   : > { %p2876_p9 = pneg %p2875_p6 }
  0x74   : > { %p2883_p4 = pnand %p2882_p10, %p2876_p9 }
  0x76   : > { %2886 = shalt.err (!%p2883_p4)
}
  0x77   : > { %2574 = dma.hbm_to_vmem [thread:$0]  (!%p3295_p13), %s432_s25, 1024, %s434_s20, %s3306_s12, %s3787_s28, %s3787_s28, %s3786_s10  }
  0x78   : > { %s474_s18 = scalar_lea.hbm %s3738_s6, %s3279_s9  ;;  %s468_s13 = scalar_lea.vmem [#allocation15], %s3276_s24 }
  0x79   : > { %s475_s0 = sshll.u32 %s468_s13, 4  ;;  %s3105_s30 = smov [#allocation15]   ;;  %s476_s0 = int_to_ptr.vmem [resolvable:$true] %s475_s0 }
  0x7a   : > { %s2900_s17 = scalar_lea.vmem %s476_s0, 1024  ;;  %s2905_s29 = sshll.u32 %s3105_s30, 4  ;;  %s2906_s29 = int_to_ptr.vmem [resolvable:$false] %s2905_s29 }
  0x7b   : > { %p2901_p11 = scmp.ne.s32.totalorder %s476_s0, %s2900_s17  ;;  %s2907_s11 = scalar_lea.vmem %s2906_s29, 2048 }
  0x7c   : > { %p2908_p8 = scmp.lt.s32.totalorder %s476_s0, %s2906_s29  ;;  %p2909_p6 = scmp.lt.s32.totalorder %s2907_s11, %s2900_s17 }
  0x7d   : > { %p2903_p1 = pnand %p2901_p11, %p3310_p0 }
  0x7e   : > { %p2910_p9 = por %p2909_p6, %p2908_p8 }
  0x7f   : > { %p2904_p3 = pneg %p2903_p1 }
  0x81   : > { %p2911_p5 = pnand %p2910_p9, %p2904_p3 }
  0x83   : > { %2914 = shalt.err (!%p2911_p5)
}
  0x84   : > { %2580 = dma.hbm_to_vmem [thread:$0]  (!%p3295_p13), %s474_s18, 1024, %s476_s0, %s3324_s3, %s3787_s28, %s3787_s28, %s3786_s10  }
  0x85   : > { %s495_s20 = scalar_lea.hbm %s3739_s7, %s3279_s9  ;;  %s489_s1 = scalar_lea.vmem [#allocation16], %s3276_s24 }
  0x86   : > { %s496_s22 = sshll.u32 %s489_s1, 4  ;;  %s3792_s13 = sand.u32 1, %s3083_s15   ;;  %s497_s22 = int_to_ptr.vmem [resolvable:$true] %s496_s22 }
  0x87   : > { %s486_s17 = scalar_lea.sflag [#allocation17], %s3792_s13  ;;  %s2928_s30 = scalar_lea.vmem %s497_s22, 1024 }
  0x88   : > { %p2929_p2 = scmp.ne.s32.totalorder %s497_s22, %s2928_s30  ;;  %s3106_s29 = smov [#allocation16]  }
  0x89   : > { %s2933_s11 = sshll.u32 %s3106_s29, 4  ;;  %s2934_s11 = int_to_ptr.vmem [resolvable:$false] %s2933_s11 }
  0x8a   : > { %p2931_p10 = pnand %p2929_p2, %p3310_p0  ;;  %s2935_s2 = scalar_lea.vmem %s2934_s11, 2048 }
  0x8b   : > { %p2936_p11 = scmp.lt.s32.totalorder %s497_s22, %s2934_s11  ;;  %p2937_p1 = scmp.lt.s32.totalorder %s2935_s2, %s2928_s30 }
  0x8c   : > { %p2932_p4 = pneg %p2931_p10 }
  0x8d   : > { %p2938_p3 = por %p2937_p1, %p2936_p11 }
  0x8f   : > { %p2939_p8 = pnand %p2938_p3, %p2932_p4 }
  0x91   : > { %2942 = shalt.err (!%p2939_p8)
}
  0x92   : > { %2583 = dma.hbm_to_vmem [thread:$0]  (!%p3295_p13), %s495_s20, 1024, %s497_s22, %s486_s17, %s3787_s28, %s3787_s28, %s3786_s10  }
  0x93   : > { %508 = sbr.rel (%p3234_p12) target bundleno = 1697 (0x6a1), region = 52  ;;  %p3793_p0 = scmp.eq.s32.totalorder (!%p3234_p12), %s3200_s19, 0 }
  0x98   : > { %3042 = dma.done.wait (%p3793_p0), [#allocation5], 128   ;;  %p3794_p6 = pmov %p3793_p0 }
  0x99   : > { %p3795_p9 = pmov %p3793_p0 }
  0x9a   : > { %3044 = vsyncadd (%p3794_p6), [#allocation5], 4294967168 }
  0x9b   : > { %3046 = dma.done.wait (%p3795_p9), [#allocation8], 2176   ;;  %p3796_p5 = pmov %p3793_p0 }
  0x9c   : > { %s3412_s2 = sand.u32 1, %s3200_s19   ;;  %s524_s3 = sand.u32 1, %s3079_s14  }
  0x9d   : > { %3048 = vsyncadd (%p3796_p5), [#allocation8], 4294965120  ;;  %s2087_s9 = sshll.u32 %s524_s3, 6  ;;  %s523_s21 = scalar_lea.sflag [#allocation11], %s3412_s2 }
  0x9e   : > { %s3416_s24 = scalar_lea.vmem [#allocation10], %s2087_s9 }
  0x9f   : > { %3050 = dma.done.wait (%p3218_p7), %s523_s21, 2048  }
  0xa0   : > { %3052 = vsyncadd (%p3218_p7), %s523_s21, 4294965248  ;;  %s3422_s26 = scalar_lea.vmem [#allocation12], %s2087_s9  ;;  %s541_s27 = scalar_lea.sflag [#allocation14], %s3412_s2 }
  0xa1   : > { %s3425_s10 = scalar_lea.vmem [#allocation13], %s2087_s9 }
  0xa2   : > { %3054 = dma.done.wait (%p3218_p7), %s541_s27, 2048  }
  0xa3   : > { %3056 = vsyncadd (%p3218_p7), %s541_s27, 4294965248  ;;  %s3431_s28 = scalar_lea.vmem [#allocation15], %s2087_s9  ;;  %s559_s18 = scalar_lea.sflag [#allocation17], %s524_s3 }
  0xa4   : > { %s3433_s0 = scalar_lea.vmem [#allocation16], %s2087_s9 }
  0xa5   : > { %3058 = dma.done.wait (%p3218_p7), %s559_s18, 1024  }
  0xa6   : > { %3060 = vsyncadd (%p3218_p7), %s559_s18, 4294966272  ;;  %s2092_s12 = sshll.u32 %s524_s3, 3  ;;  %p2093_p12 = scmp.ne.s32.totalorder %s3087_s16, 0 }
  0xa7   : > { %s3439_s25 = scalar_lea.vmem [#allocation21], %s2092_s12 }
  0xa8   : > { %629 = sbr.rel (%p2093_p12) target bundleno = 178 (0xb2), region = 88 }
  0xad   : > { %v2167_v0 = vld [vmem:[#allocation4] sm:$0xff]   ;;  %v2171_v1 = vld [vmem:[#allocation9] sm:$0xff]  }
  0xae   : > { %v2168_v2 = vunpack.c.l.bf16 %v2167_v0  ;;  %v2169_v3 = vunpack.c.h.bf16 %v2167_v0  ;;  %v2172_v4 = vunpack.c.l.bf16 %v2171_v1  ;;  %v2173_v5 = vunpack.c.h.bf16 %v2171_v1 }
  0xb0   : > { %634 = vst [vmem:[#allocation2] sm:$0xff] %v2168_v2  ;;  %635 = vst [vmem:[#allocation2 + $0x8] sm:$0xff] %v2169_v3 }
  0xb1   : > { %640 = vst [vmem:[#allocation3 + $0x8] sm:$0xff] %v2172_v4  ;;  %641 = vst [vmem:[#allocation3] sm:$0xff] %v2173_v5 }
  0xb2 PF: > { %v2661_v6 = vld [vmem:[%s3422_s26 + $0x38] sm:$0xff]   ;;  %v2662_v7 = vld [vmem:[%s3422_s26 + $0x30] sm:$0xff]   ;;  %v3107_v8 = vmov 0.0   ;;  %vm3108_vm0 = vmmov 0   ;;  %v2663_v9 = vld [vmem:[%s3422_s26 + $0x28] sm:$0xff]   ;;  %p2150_p7 = scmp.ne.s32.totalorder %s3087_s16, 1 }
  0xb3   : > { %2290 = vmatprep.subr.bf16.mxu0 %v3107_v8  ;;  %2310 = vmatprep.subr.bf16.mxu1 %v2661_v6  ;;  %v2664_v10 = vld [vmem:[%s3422_s26 + $0x20] sm:$0xff]   ;;  %v3449_v11 = vld [vmem:[#allocation7] sm:$0xff]   ;;  %v2666_v13 = vld [vmem:[%s3422_s26 + $0x10] sm:$0xff]  }
  0xb4   : > { %2306 = vmatprep.mubr.msk.bf16.mxu0 %vm3108_vm0, %v3107_v8  ;;  %2311 = vmatpush3.bf16.msra.mxu1 %v2661_v6  ;;  %v2665_v12 = vld [vmem:[%s3422_s26 + $0x18] sm:$0xff]   ;;  %v2667_v14 = vld [vmem:[%s3422_s26 + $0x8] sm:$0xff]   ;;  %v2668_v15 = vld [vmem:[%s3422_s26] sm:$0xff]  }
  0xb5   : > { %2312 = vmatprep.subr.bf16.mxu1 %v2662_v7  ;;  %2326 = vmatprep.mubr.bf16.mxu1 %v3449_v11  ;;  %v2685_v16 = vld [vmem:[%s3416_s24 + $0x38] sm:$0xff]   ;;  %v2686_v17 = vld [vmem:[%s3416_s24 + $0x30] sm:$0xff]   ;;  %v3459_v18 = vld [vmem:[#allocation7 + $0x8] sm:$0xff]  }
  0xb6   : > { %2291 = vmatpush3.bf16.msra.mxu0 %v2685_v16  ;;  %v2687_v19 = vld [vmem:[%s3416_s24 + $0x28] sm:$0xff]   ;;  %v2688_v21 = vld [vmem:[%s3416_s24 + $0x20] sm:$0xff]   ;;  %v3470_v22 = vld [vmem:[#allocation7 + $0x18] sm:$0xff]  }
  0xb7   : > { %2292 = vmatprep.subr.bf16.mxu0 %v3107_v8  ;;  %v3462_v20 = vld [vmem:[#allocation7 + $0x10] sm:$0xff]   ;;  %v2689_v23 = vld [vmem:[%s3416_s24 + $0x18] sm:$0xff]   ;;  %v2690_v25 = vld [vmem:[%s3416_s24 + $0x10] sm:$0xff]  }
  0xb8   : > { %2313 = vmatpush3.bf16.msra.mxu1 %v2662_v7  ;;  %v3473_v24 = vld [vmem:[#allocation7 + $0x20] sm:$0xff]   ;;  %v3480_v26 = vld [vmem:[#allocation7 + $0x28] sm:$0xff]   ;;  %v2691_v27 = vld [vmem:[%s3416_s24 + $0x8] sm:$0xff]  }
  0xb9   : > { %2314 = vmatprep.subr.bf16.mxu1 %v2663_v9  ;;  %v2675_v28 = vld [vmem:[#allocation7 + $0x30] sm:$0xff]   ;;  %v2692_v29 = vld [vmem:[%s3416_s24] sm:$0xff]   ;;  %v3485_v30 = vld [vmem:[#allocation2] sm:$0xff] }
  0xba   : > { %2293 = vmatpush3.bf16.msra.mxu0 %v2686_v17  ;;  %v3487_v31 = vld [vmem:[#allocation2 + $0x8] sm:$0xff]  ;;  %v2676_v34 = vld [vmem:[#allocation7 + $0x38] sm:$0xff]   ;;  %v2695_v37 = vld [vmem:[%s3425_s10 + $0x28] sm:$0xff]  }
  0xbb   : > { %2294 = vmatprep.subr.bf16.mxu0 %v3107_v8  ;;  %v2693_v32 = vld [vmem:[%s3425_s10 + $0x38] sm:$0xff]   ;;  %v646_v33 = vpack.c.bf16 %v3487_v31, %v3485_v30  ;;  %v2694_v36 = vld [vmem:[%s3425_s10 + $0x30] sm:$0xff]   ;;  %v2678_v38 = vld [vmem:[#allocation7 + $0x48] sm:$0xff]  }
  0xbc   : > { %2315 = vmatpush3.bf16.msra.mxu1 %v2663_v9  ;;  %v2677_v35 = vld [vmem:[#allocation7 + $0x40] sm:$0xff]   ;;  %v2679_v39 = vld [vmem:[#allocation7 + $0x50] sm:$0xff]   ;;  %v2696_v40 = vld [vmem:[%s3425_s10 + $0x20] sm:$0xff]  }
  0xbd   : > { %2316 = vmatprep.subr.bf16.mxu1 %v2664_v10  ;;  %v2697_v41 = vld [vmem:[%s3425_s10 + $0x18] sm:$0xff]   ;;  %v2680_v42 = vld [vmem:[#allocation7 + $0x58] sm:$0xff]   ;;  %v2699_v45 = vld [vmem:[%s3425_s10 + $0x8] sm:$0xff]  }
  0xbe   : > { %2295 = vmatpush3.bf16.msra.mxu0 %v2687_v19  ;;  %v2681_v43 = vld [vmem:[#allocation7 + $0x60] sm:$0xff]   ;;  %v2698_v44 = vld [vmem:[%s3425_s10 + $0x10] sm:$0xff]   ;;  %v2682_v46 = vld [vmem:[#allocation7 + $0x68] sm:$0xff]  }
  0xbf   : > { %2296 = vmatprep.subr.bf16.mxu0 %v3107_v8  ;;  %v2683_v47 = vld [vmem:[#allocation7 + $0x70] sm:$0xff]   ;;  %v2684_v48 = vld [vmem:[#allocation7 + $0x78] sm:$0xff]   ;;  %v2700_v49 = vld [vmem:[%s3425_s10] sm:$0xff]  }
  0xc0   : > { %2317 = vmatpush3.bf16.msra.mxu1 %v2664_v10 }
  0xc1   : > { %2318 = vmatprep.subr.bf16.mxu1 %v2665_v12 }
  0xc2   : > { %2297 = vmatpush3.bf16.msra.mxu0 %v2688_v21 }
  0xc3   : > { %2298 = vmatprep.subr.bf16.mxu0 %v3107_v8 }
  0xc4   : > { %2319 = vmatpush3.bf16.msra.mxu1 %v2665_v12 }
  0xc5   : > { %2320 = vmatprep.subr.bf16.mxu1 %v2666_v13 }
  0xc6   : > { %2299 = vmatpush3.bf16.msra.mxu0 %v2689_v23 }
  0xc7   : > { %2300 = vmatprep.subr.bf16.mxu0 %v3107_v8 }
  0xc8   : > { %2321 = vmatpush3.bf16.msra.mxu1 %v2666_v13 }
  0xc9   : > { %2322 = vmatprep.subr.bf16.mxu1 %v2667_v14 }
  0xca   : > { %2301 = vmatpush3.bf16.msra.mxu0 %v2690_v25 }
  0xcb   : > { %2302 = vmatprep.subr.bf16.mxu0 %v3107_v8 }
  0xcc   : > { %2323 = vmatpush3.bf16.msra.mxu1 %v2667_v14 }
  0xcd   : > { %2324 = vmatprep.subr.bf16.mxu1 %v2668_v15 }
  0xce   : > { %2303 = vmatpush3.bf16.msra.mxu0 %v2691_v27 }
  0xcf   : > { %2304 = vmatprep.subr.bf16.mxu0 %v3107_v8 }
  0xd0   : > { %2325 = vmatpush3.bf16.msra.mxu1 %v2668_v15 }
  0xd1   : > { %2406 = vmatprep.subr.bf16.mxu1 %v3107_v8 }
  0xd2   : > { %2305 = vmatpush3.bf16.msra.mxu0 %v2692_v29 }
  0xd3   : > { %2327 = vmatmul.mubr.bf16.vlgmr.msra.gmra.mxu1 %v3459_v18  ;;  %2358 = vmatprep.subr.bf16.mxu0 %v2693_v32 }
  0xd4   : > { %2330 = vmatprep.mubr.bf16.mxu1 %v3462_v20 }
  0xd5   : > { %2307 = vmatmul.mubr.bf16.vlgmr.msra.gmra.mxu0 %v646_v33 }
  0xd6   : > { %2359 = vmatpush3.bf16.msra.mxu0 %v2693_v32  ;;  %2374 = vmatprep.mubr.bf16.mxu0 %v3449_v11 }
  0xd7   : > { %2360 = vmatprep.subr.bf16.mxu0 %v2694_v36 }
  0xda   : > { %2361 = vmatpush3.bf16.msra.mxu0 %v2694_v36 }
  0xdb   : > { %2331 = vmatmul.mubr.bf16.gmra.mxu1 %v3470_v22  ;;  %2362 = vmatprep.subr.bf16.mxu0 %v2695_v37 }
  0xdc   : > { %2334 = vmatprep.mubr.bf16.mxu1 %v3473_v24 }
  0xde   : > { %2363 = vmatpush3.bf16.msra.mxu0 %v2695_v37 }
  0xdf   : > { %2364 = vmatprep.subr.bf16.mxu0 %v2696_v40 }
  0xe2   : > { %2365 = vmatpush3.bf16.msra.mxu0 %v2696_v40 }
  0xe3   : > { %2335 = vmatmul.mubr.bf16.gmra.mxu1 %v3480_v26  ;;  %2366 = vmatprep.subr.bf16.mxu0 %v2697_v41 }
  0xe4   : > { %2338 = vmatprep.mubr.bf16.mxu1 %v2675_v28 }
  0xe6   : > { %2367 = vmatpush3.bf16.msra.mxu0 %v2697_v41 }
  0xe7   : > { %2368 = vmatprep.subr.bf16.mxu0 %v2698_v44 }
  0xea   : > { %2369 = vmatpush3.bf16.msra.mxu0 %v2698_v44 }
  0xeb   : > { %2339 = vmatmul.mubr.bf16.gmra.mxu1 %v2676_v34  ;;  %2370 = vmatprep.subr.bf16.mxu0 %v2699_v45 }
  0xec   : > { %2342 = vmatprep.mubr.bf16.mxu1 %v2677_v35 }
  0xee   : > { %2371 = vmatpush3.bf16.msra.mxu0 %v2699_v45 }
  0xef   : > { %2372 = vmatprep.subr.bf16.mxu0 %v2700_v49 }
  0xf2   : > { %2373 = vmatpush3.bf16.msra.mxu0 %v2700_v49 }
  0xf3   : > { %2343 = vmatmul.mubr.bf16.gmra.mxu1 %v2678_v38  ;;  %2426 = vmatprep.subr.bf16.mxu0 %v3107_v8 }
  0xf4   : > { %2346 = vmatprep.mubr.bf16.mxu1 %v2679_v39 }
  0xf5   : > { %2375 = vmatmul.mubr.bf16.vlgmr.msra.gmra.mxu0 %v3459_v18 }
  0xf6   : > { %2378 = vmatprep.mubr.bf16.mxu0 %v3462_v20 }
  0xfb   : > { %2347 = vmatmul.mubr.bf16.gmra.mxu1 %v2680_v42 }
  0xfc   : > { %2350 = vmatprep.mubr.bf16.mxu1 %v2681_v43 }
  0xfd   : > { %2379 = vmatmul.mubr.bf16.gmra.mxu0 %v3470_v22 }
  0xfe   : > { %2382 = vmatprep.mubr.bf16.mxu0 %v3473_v24 }
 0x103   : > { %2351 = vmatmul.mubr.bf16.gmra.mxu1 %v2682_v46 }
 0x104   : > { %2354 = vmatprep.mubr.bf16.mxu1 %v2683_v47 }
 0x105   : > { %2383 = vmatmul.mubr.bf16.gmra.mxu0 %v3480_v26 }
 0x106   : > { %2386 = vmatprep.mubr.bf16.mxu0 %v2675_v28 }
 0x10b   : > { %2355 = vmatmul.mubr.bf16.gmra.mxu1 %v2684_v48 }
 0x10c   : > { %2422 = vmatprep.mubr.msk.bf16.mxu1 %vm3108_vm0, %v3107_v8 }
 0x10d   : > { %2387 = vmatmul.mubr.bf16.gmra.mxu0 %v2676_v34 }
 0x10e   : > { %2390 = vmatprep.mubr.bf16.mxu0 %v2677_v35 }
 0x115   : > { %2391 = vmatmul.mubr.bf16.gmra.mxu0 %v2678_v38 }
 0x116   : > { %2394 = vmatprep.mubr.bf16.mxu0 %v2679_v39 }
 0x11d   : > { %2395 = vmatmul.mubr.bf16.gmra.mxu0 %v2680_v42 }
 0x11e   : > { %2398 = vmatprep.mubr.bf16.mxu0 %v2681_v43 }
 0x125   : > { %2399 = vmatmul.mubr.bf16.gmra.mxu0 %v2682_v46 }
 0x126   : > { %2402 = vmatprep.mubr.bf16.mxu0 %v2683_v47 }
 0x12d   : > { %2403 = vmatmul.mubr.bf16.gmra.mxu0 %v2684_v48 }
 0x12e   : > { %2442 = vmatprep.mubr.msk.bf16.mxu0 %vm3108_vm0, %v3107_v8 }
 0x193   : > { %v3512_v50 = vpop.f32.mrf.mxu1 }
 0x195   : > { %v3514_v51 = vpop.f32.mrf.mxu1  ;;  %v3524_v0 = vpop.f32.mrf.mxu0 }
 0x196   : > { %v1330_v49 = vpack.c.bf16 %v3524_v0, %v3524_v0 }
 0x197   : > { %v3516_v52 = vpop.f32.mrf.mxu1  ;;  %v2308_v2 = vpop.f32.mrf.mxu0 }
 0x198   : > { %v1333_v53 = vpack.c.bf16 %v3516_v52, %v3512_v50 }
 0x199   : > { %v3520_v54 = vpop.f32.mrf.mxu1  ;;  %v3526_v4 = vpop.f32.mrf.mxu0 }
 0x19a   : > { %v1332_v55 = vpack.c.bf16 %v3520_v54, %v3514_v51 }
 0x19b   : > { %v2332_v56 = vpop.f32.mrf.mxu1  ;;  %v2309_v7 = vpop.f32.mrf.mxu0 }
 0x19d   : > { %v994_v57 = vpop.f32.mrf.mxu1 }
 0x19f   : > { %v2333_v58 = vpop.f32.mrf.mxu1 }
 0x1a0   : > { %v1335_v32 = vpack.c.bf16 %v2333_v58, %v2332_v56 }
 0x1a1   : > { %v997_v59 = vpop.f32.mrf.mxu1 }
 0x1a2   : > { %v1334_v35 = vpack.c.bf16 %v997_v59, %v994_v57 }
 0x1a3   : > { %v2336_v60 = vpop.f32.mrf.mxu1 }
 0x1a5   : > { %v1010_v61 = vpop.f32.mrf.mxu1 }
 0x1a7   : > { %v2337_v62 = vpop.f32.mrf.mxu1 }
 0x1a8   : > { %v1337_v20 = vpack.c.bf16 %v2337_v62, %v2336_v60 }
 0x1a9   : > { %v1013_v63 = vpop.f32.mrf.mxu1 }
 0x1aa   : > { %v1336_v25 = vpack.c.bf16 %v1013_v63, %v1010_v61 }
 0x1ab   : > { %v2340_v1 = vpop.f32.mrf.mxu1 }
 0x1ad   : > { %v1026_v3 = vpop.f32.mrf.mxu1 }
 0x1af   : > { %v2341_v5 = vpop.f32.mrf.mxu1 }
 0x1b0   : > { %v1339_v6 = vpack.c.bf16 %v2341_v5, %v2340_v1 }
 0x1b1   : > { %v1029_v9 = vpop.f32.mrf.mxu1 }
 0x1b2   : > { %2407 = vmatpush3.bf16.xpose.msra.mxu1 %v1339_v6  ;;  %v1338_v13 = vpack.c.bf16 %v1029_v9, %v1026_v3 }
 0x1b3   : > { %v3528_v10 = vpop.f32.mrf.mxu1  ;;  %2408 = vmatprep.subr.bf16.mxu1 %v3107_v8 }
 0x1b5   : > { %v3531_v11 = vpop.f32.mrf.mxu1  ;;  %v3550_v37 = vpop.f32.mrf.mxu0 }
 0x1b7   : > { %v3533_v12 = vpop.f32.mrf.mxu1  ;;  %v3554_v38 = vpop.f32.mrf.mxu0 }
 0x1b8   : > { %v1341_v14 = vpack.c.bf16 %v3533_v12, %v3528_v10 }
 0x1b9   : > { %v3537_v15 = vpop.f32.mrf.mxu1  ;;  %v3556_v39 = vpop.f32.mrf.mxu0 }
 0x1ba   : > { %v1340_v16 = vpack.c.bf16 %v3537_v15, %v3531_v11  ;;  %2409 = vmatpush3.bf16.xpose.msra.mxu1 %v1338_v13  ;;  %v1456_v12 = vpack.c.bf16 %v3556_v39, %v3550_v37 }
 0x1bb   : > { %v2348_v17 = vpop.f32.mrf.mxu1  ;;  %2410 = vmatprep.subr.bf16.mxu1 %v3107_v8  ;;  %v3558_v40 = vpop.f32.mrf.mxu0 }
 0x1bd   : > { %v3542_v18 = vpop.f32.mrf.mxu1  ;;  %v2380_v42 = vpop.f32.mrf.mxu0 }
 0x1bf   : > { %v2349_v19 = vpop.f32.mrf.mxu1  ;;  %v1219_v43 = vpop.f32.mrf.mxu0 }
 0x1c1   : > { %v3544_v21 = vpop.f32.mrf.mxu1  ;;  %v2381_v44 = vpop.f32.mrf.mxu0 }
 0x1c2   : > { %2411 = vmatpush3.bf16.xpose.msra.mxu1 %v1337_v20  ;;  %v1342_v58 = vpack.c.bf16 %v3544_v21, %v3542_v18  ;;  %v1458_v5 = vpack.c.bf16 %v2381_v44, %v2380_v42 }
 0x1c3   : > { %v2352_v22 = vpop.f32.mrf.mxu1  ;;  %2412 = vmatprep.subr.bf16.mxu1 %v3107_v8  ;;  %v1222_v45 = vpop.f32.mrf.mxu0 }
 0x1c4   : > { %v1457_v9 = vpack.c.bf16 %v1222_v45, %v1219_v43 }
 0x1c5   : > { %v1074_v23 = vpop.f32.mrf.mxu1  ;;  %v2384_v47 = vpop.f32.mrf.mxu0 }
 0x1c7   : > { %v2353_v24 = vpop.f32.mrf.mxu1  ;;  %v1235_v48 = vpop.f32.mrf.mxu0 }
 0x1c8   : > { %v1345_v41 = vpack.c.bf16 %v2353_v24, %v2352_v22 }
 0x1c9   : > { %v1077_v26 = vpop.f32.mrf.mxu1  ;;  %v2385_v50 = vpop.f32.mrf.mxu0 }
 0x1ca   : > { %2413 = vmatpush3.bf16.xpose.msra.mxu1 %v1336_v25  ;;  %v1344_v46 = vpack.c.bf16 %v1077_v26, %v1074_v23  ;;  %v1460_v62 = vpack.c.bf16 %v2385_v50, %v2384_v47 }
 0x1cb   : > { %v2356_v27 = vpop.f32.mrf.mxu1  ;;  %2414 = vmatprep.subr.bf16.mxu1 %v3107_v8  ;;  %v1238_v52 = vpop.f32.mrf.mxu0 }
 0x1cc   : > { %v1459_v1 = vpack.c.bf16 %v1238_v52, %v1235_v48 }
 0x1cd   : > { %v1090_v28 = vpop.f32.mrf.mxu1  ;;  %v2388_v56 = vpop.f32.mrf.mxu0 }
 0x1cf   : > { %v2357_v29 = vpop.f32.mrf.mxu1  ;;  %v1251_v51 = vpop.f32.mrf.mxu0 }
 0x1d0   : > { %v1347_v33 = vpack.c.bf16 %v2357_v29, %v2356_v27 }
 0x1d1   : > { %v1093_v34 = vpop.f32.mrf.mxu1  ;;  %v2389_v54 = vpop.f32.mrf.mxu0 }
 0x1d2   : > { %2415 = vmatpush3.bf16.xpose.msra.mxu1 %v1335_v32  ;;  %2427 = vmatpush3.bf16.xpose.msra.mxu0 %v1347_v33  ;;  %v1346_v36 = vpack.c.bf16 %v1093_v34, %v1090_v28  ;;  %v1430_v28 = vlaneseq }
 0x1d3   : > { %2416 = vmatprep.subr.bf16.mxu1 %v3107_v8  ;;  %2428 = vmatprep.subr.bf16.mxu0 %v3107_v8  ;;  %v1254_v57 = vpop.f32.mrf.mxu0 }
 0x1d4   : > { %v1461_v59 = vpack.c.bf16 %v1254_v57, %v1251_v51  ;;  %v1431_v29 = vand.u32 127, %v1430_v28 }
 0x1d5   : > { %v3577_v60 = vpop.f32.mrf.mxu0 }
 0x1d6   : > { %vm1432_vm1 = vcmp.lt.s32.totalorder %v1431_v29, 16 }
 0x1d7   : > { %v3581_v61 = vpop.f32.mrf.mxu0 }
 0x1d9   : > { %v2393_v63 = vpop.f32.mrf.mxu0 }
 0x1da   : > { %2417 = vmatpush3.bf16.xpose.msra.mxu1 %v1334_v35  ;;  %2429 = vmatpush3.bf16.xpose.msra.mxu0 %v1346_v36  ;;  %v1464_v26 = vpack.c.bf16 %v2393_v63, %v3577_v60  ;;  %v2703_v63 = vld [vmem:[%s3431_s28 + $0x28] sm:$0xff]  }
 0x1db   : > { %2418 = vmatprep.subr.bf16.mxu1 %v3107_v8  ;;  %2430 = vmatprep.subr.bf16.mxu0 %v3107_v8  ;;  %v1270_v0 = vpop.f32.mrf.mxu0 }
 0x1dc   : > { %v1463_v27 = vpack.c.bf16 %v1270_v0, %v3581_v61  ;;  %v2701_v61 = vld [vmem:[%s3431_s28 + $0x38] sm:$0xff]   ;;  %v2704_v0 = vld [vmem:[%s3431_s28 + $0x20] sm:$0xff]  }
 0x1dd   : > { %v2396_v2 = vpop.f32.mrf.mxu0 }
 0x1df   : > { %v1283_v3 = vpop.f32.mrf.mxu0 }
 0x1e1   : > { %v2397_v6 = vpop.f32.mrf.mxu0 }
 0x1e2   : > { %2419 = vmatpush3.bf16.xpose.msra.mxu1 %v1333_v53  ;;  %2431 = vmatpush3.bf16.xpose.msra.mxu0 %v1345_v41  ;;  %v1343_v53 = vpack.c.bf16 %v2349_v19, %v2348_v17  ;;  %v1331_v17 = vpack.c.bf16 %v3526_v4, %v3526_v4  ;;  %v1455_v19 = vpack.c.bf16 %v3558_v40, %v3554_v38 }
 0x1e3   : > { %2420 = vmatprep.subr.bf16.mxu1 %v3107_v8  ;;  %2432 = vmatprep.subr.bf16.mxu0 %v3107_v8  ;;  %v1286_v7 = vpop.f32.mrf.mxu0  ;;  %v1466_v24 = vpack.c.bf16 %v2397_v6, %v2396_v2  ;;  %v2706_v2 = vld [vmem:[%s3431_s28 + $0x10] sm:$0xff]   ;;  %v2709_v6 = vld [vmem:[%s3433_s0 + $0x38] sm:$0xff]  }
 0x1e4   : > { %v1465_v25 = vpack.c.bf16 %v1286_v7, %v1283_v3  ;;  %v2707_v3 = vld [vmem:[%s3431_s28 + $0x8] sm:$0xff]   ;;  %v2710_v7 = vld [vmem:[%s3433_s0 + $0x30] sm:$0xff]  }
 0x1e5   : > { %v2400_v13 = vpop.f32.mrf.mxu0 }
 0x1e7   : > { %v1299_v10 = vpop.f32.mrf.mxu0 }
 0x1ea   : > { %2421 = vmatpush3.bf16.xpose.msra.mxu1 %v1332_v55  ;;  %2433 = vmatpush3.bf16.xpose.msra.mxu0 %v1344_v46  ;;  %v1462_v55 = vpack.c.bf16 %v2389_v54, %v2388_v56 }
 0x1eb   : > { %2434 = vmatprep.subr.bf16.mxu0 %v3107_v8  ;;  %2446 = vmatprep.subr.bf16.mxu1 %v3107_v8 }
 0x1f1   : > { %2423 = vmatmul.mubr.bf16.vlgmr.msra.gmra.mxu1 %v1330_v49 }
 0x1f2   : > { %2435 = vmatpush3.bf16.xpose.msra.mxu0 %v1343_v53  ;;  %2462 = vmatprep.mubr.msk.bf16.mxu1 %vm3108_vm0, %v3107_v8 }
 0x1f3   : > { %2436 = vmatprep.subr.bf16.mxu0 %v3107_v8  ;;  %2447 = vmatpush3.bf16.msra.mxu1 %v1462_v55 }
 0x1f4   : > { %2448 = vmatprep.subr.bf16.mxu1 %v3107_v8 }
 0x1f7   : > { %2449 = vmatpush3.bf16.msra.mxu1 %v1461_v59 }
 0x1f8   : > { %2450 = vmatprep.subr.bf16.mxu1 %v3107_v8 }
 0x1fa   : > { %2437 = vmatpush3.bf16.xpose.msra.mxu0 %v1342_v58 }
 0x1fb   : > { %2438 = vmatprep.subr.bf16.mxu0 %v3107_v8  ;;  %2451 = vmatpush3.bf16.msra.mxu1 %v1460_v62  ;;  %v2702_v62 = vld [vmem:[%s3431_s28 + $0x30] sm:$0xff]  }
 0x1fc   : > { %2452 = vmatprep.subr.bf16.mxu1 %v3107_v8 }
 0x1ff   : > { %2453 = vmatpush3.bf16.msra.mxu1 %v1459_v1  ;;  %v2705_v1 = vld [vmem:[%s3431_s28 + $0x18] sm:$0xff]  }
 0x200   : > { %2454 = vmatprep.subr.bf16.mxu1 %v3107_v8 }
 0x202   : > { %2439 = vmatpush3.bf16.xpose.msra.mxu0 %v1341_v14  ;;  %v2401_v14 = vpop.f32.mrf.mxu0 }
 0x203   : > { %2440 = vmatprep.subr.bf16.mxu0 %v3107_v8  ;;  %2455 = vmatpush3.bf16.msra.mxu1 %v1458_v5  ;;  %v1468_v22 = vpack.c.bf16 %v2401_v14, %v2400_v13  ;;  %v2708_v5 = vld [vmem:[%s3431_s28] sm:$0xff]  }
 0x204   : > { %2456 = vmatprep.subr.bf16.mxu1 %v3107_v8  ;;  %v1302_v18 = vpop.f32.mrf.mxu0  ;;  %v2712_v13 = vld [vmem:[%s3433_s0 + $0x20] sm:$0xff]  }
 0x205   : > { %v1467_v23 = vpack.c.bf16 %v1302_v18, %v1299_v10  ;;  %v2713_v10 = vld [vmem:[%s3433_s0 + $0x18] sm:$0xff]  }
 0x206   : > { %v2404_v11 = vpop.f32.mrf.mxu0 }
 0x207   : > { %2457 = vmatpush3.bf16.msra.mxu1 %v1457_v9  ;;  %v2711_v9 = vld [vmem:[%s3433_s0 + $0x28] sm:$0xff]  }
 0x208   : > { %2458 = vmatprep.subr.bf16.mxu1 %v3107_v8  ;;  %v1315_v15 = vpop.f32.mrf.mxu0 }
 0x20a   : > { %2441 = vmatpush3.bf16.xpose.msra.mxu0 %v1340_v16  ;;  %v2405_v16 = vpop.f32.mrf.mxu0 }
 0x20b   : > { %2466 = vmatprep.subr.bf16.mxu0 %v3107_v8  ;;  %2459 = vmatpush3.bf16.msra.mxu1 %v1456_v12  ;;  %v1470_v20 = vpack.c.bf16 %v2405_v16, %v2404_v11  ;;  %v2714_v12 = vld [vmem:[%s3433_s0 + $0x10] sm:$0xff]  }
 0x20c   : > { %2460 = vmatprep.subr.bf16.mxu1 %v3107_v8  ;;  %v1318_v21 = vpop.f32.mrf.mxu0 }
 0x20d   : > { %v1469_v4 = vpack.c.bf16 %v1318_v21, %v1315_v15 }
 0x20f   : > { %2461 = vmatpush3.bf16.msra.mxu1 %v1455_v19 }
 0x210   : > { %2486 = vmatprep.subr.bf16.mxu1 %v3107_v8 }
 0x211   : > { %2443 = vmatmul.mubr.bf16.vlgmr.msra.gmra.mxu0 %v1331_v17 }
 0x212   : > { %2482 = vmatprep.mubr.msk.bf16.mxu0 %vm3108_vm0, %v3107_v8  ;;  %2467 = vmatpush3.bf16.msra.mxu0 %v1470_v20 }
 0x213   : > { %2468 = vmatprep.subr.bf16.mxu0 %v3107_v8 }
 0x216   : > { %2469 = vmatpush3.bf16.msra.mxu0 %v1469_v4  ;;  %v2715_v4 = vld [vmem:[%s3433_s0 + $0x8] sm:$0xff]  }
 0x217   : > { %2470 = vmatprep.subr.bf16.mxu0 %v3107_v8 }
 0x21a   : > { %2471 = vmatpush3.bf16.msra.mxu0 %v1468_v22  ;;  %v2716_v22 = vld [vmem:[%s3433_s0] sm:$0xff]  }
 0x21b   : > { %2472 = vmatprep.subr.bf16.mxu0 %v3107_v8 }
 0x21e   : > { %2473 = vmatpush3.bf16.msra.mxu0 %v1467_v23 }
 0x21f   : > { %2474 = vmatprep.subr.bf16.mxu0 %v3107_v8 }
 0x222   : > { %2475 = vmatpush3.bf16.msra.mxu0 %v1466_v24 }
 0x223   : > { %2476 = vmatprep.subr.bf16.mxu0 %v3107_v8 }
 0x226   : > { %2477 = vmatpush3.bf16.msra.mxu0 %v1465_v25 }
 0x227   : > { %2478 = vmatprep.subr.bf16.mxu0 %v3107_v8 }
 0x22a   : > { %2479 = vmatpush3.bf16.msra.mxu0 %v1464_v26 }
 0x22b   : > { %2480 = vmatprep.subr.bf16.mxu0 %v3107_v8 }
 0x22e   : > { %2481 = vmatpush3.bf16.msra.mxu0 %v1463_v27 }
 0x22f   : > { %2506 = vmatprep.subr.bf16.mxu0 %v3107_v8 }
 0x2b1   : > { %v1382_v32 = vpop.f32.mrf.mxu1 }
 0x2b2   : > { %v1428_v33 = vmul.f32 0.17677669, %v1382_v32  ;;  %v644_v32 = vld [vmem:[#allocation3 + $0x8] sm:$0xff] }
 0x2b3   : > { %v2424_v34 = vpop.f32.mrf.mxu1 }
 0x2b4   : > { %v1433_v35 = vsel %vm1432_vm1, %v1428_v33, -1e+30 }
 0x2b5   : > { %1435 = vmax.xlane.f32.xlu0 %v1433_v35  ;;  %v1385_v36 = vpop.f32.mrf.mxu1 }
 0x2b6   : > { %v645_v36 = vld [vmem:[#allocation3] sm:$0xff] }
 0x2b7   : > { %v2425_v37 = vpop.f32.mrf.mxu1 }
 0x2d1   : > { %v1422_v38 = vpop.f32.mrf.mxu0 }
 0x2d2   : > { %v1429_v39 = vmul.f32 0.17677669, %v1422_v38 }
 0x2d3   : > { %v2444_v40 = vpop.f32.mrf.mxu0 }
 0x2d4   : > { %v1434_v41 = vsel %vm1432_vm1, %v1429_v39, -1e+30 }
 0x2d5   : > { %1437 = vmax.xlane.f32.xlu0 %v1434_v41  ;;  %v1425_v42 = vpop.f32.mrf.mxu0 }
 0x2d7   : > { %v2445_v43 = vpop.f32.mrf.mxu0 }
 0x33e   : > { %v1436_v44 = vpop.xlane.xlu0 %1435 }
 0x33f   : > { %v1439_v45 = vsub.f32 %v1433_v35, %v1436_v44 }
 0x341   : > { %v1441_v46 = vmul.f32 1.442695, %v1439_v45 }
 0x343   : > { %2717 = vpow2.f32 %v1441_v46 }
 0x350   : > { %v2718_v47 = vpop.eup %2717 }
 0x351   : > { %1445 = vadd.xlane.f32.xlu1 %v2718_v47 }
 0x35e   : > { %v1438_v48 = vpop.xlane.xlu0 %1437 }
 0x35f   : > { %v1440_v49 = vsub.f32 %v1434_v41, %v1438_v48 }
 0x361   : > { %v1443_v50 = vmul.f32 1.442695, %v1440_v49 }
 0x363   : > { %2719 = vpow2.f32 %v1443_v50 }
 0x370   : > { %v2720_v52 = vpop.eup %2719 }
 0x371   : > { %1447 = vadd.xlane.f32.xlu1 %v2720_v52 }
 0x3da   : > { %v1446_v53 = vpop.xlane.xlu1 %1445 }
 0x3db   : > { %2721 = vrcp.f32 %v1446_v53 }
 0x3e8   : > { %v2722_v56 = vpop.eup %2721 }
 0x3e9   : > { %v1451_v51 = vmul.f32 %v2722_v56, %v2718_v47 }
 0x3eb   : > { %v1453_v54 = vpack.c.bf16 %v1451_v51, %v1451_v51 }
 0x3ed   : > { %2463 = vmatmul.mubr.bf16.vlgmr.msra.gmra.mxu1 %v1453_v54 }
 0x3ee   : > { %2502 = vmatprep.mubr.msk.bf16.mxu1 %vm3108_vm0, %v3107_v8  ;;  %2487 = vmatpush3.bf16.msra.mxu1 %v2701_v61 }
 0x3ef   : > { %2488 = vmatprep.subr.bf16.mxu1 %v3107_v8 }
 0x3f2   : > { %2489 = vmatpush3.bf16.msra.mxu1 %v2702_v62 }
 0x3f3   : > { %2490 = vmatprep.subr.bf16.mxu1 %v3107_v8 }
 0x3f6   : > { %2491 = vmatpush3.bf16.msra.mxu1 %v2703_v63 }
 0x3f7   : > { %2492 = vmatprep.subr.bf16.mxu1 %v3107_v8 }
 0x3fa   : > { %v1448_v55 = vpop.xlane.xlu1 %1447  ;;  %2493 = vmatpush3.bf16.msra.mxu1 %v2704_v0 }
 0x3fb   : > { %2723 = vrcp.f32 %v1448_v55  ;;  %2494 = vmatprep.subr.bf16.mxu1 %v3107_v8 }
 0x3fe   : > { %2495 = vmatpush3.bf16.msra.mxu1 %v2705_v1 }
 0x3ff   : > { %2496 = vmatprep.subr.bf16.mxu1 %v3107_v8 }
 0x402   : > { %2497 = vmatpush3.bf16.msra.mxu1 %v2706_v2 }
 0x403   : > { %2498 = vmatprep.subr.bf16.mxu1 %v3107_v8 }
 0x406   : > { %2499 = vmatpush3.bf16.msra.mxu1 %v2707_v3 }
 0x407   : > { %2500 = vmatprep.subr.bf16.mxu1 %v3107_v8 }
 0x408   : > { %v2724_v57 = vpop.eup %2723 }
 0x409   : > { %v1452_v58 = vmul.f32 %v2724_v57, %v2720_v52 }
 0x40a   : > { %2501 = vmatpush3.bf16.msra.mxu1 %v2708_v5 }
 0x40b   : > { %v1454_v59 = vpack.c.bf16 %v1452_v58, %v1452_v58  ;;  %v2177_v60 = vpack.c.bf16 %v1452_v58, %v1451_v51 }
 0x40d   : > { %2483 = vmatmul.mubr.bf16.vlgmr.msra.gmra.mxu0 %v1454_v59  ;;  %2178 = vst [vmem:[%s3439_s25] sm:$0xff] %v2177_v60  }
 0x40e   : > { %2522 = vmatprep.mubr.msk.bf16.mxu0 %vm3108_vm0, %v3107_v8  ;;  %2507 = vmatpush3.bf16.msra.mxu0 %v2709_v6 }
 0x40f   : > { %2508 = vmatprep.subr.bf16.mxu0 %v3107_v8 }
 0x412   : > { %2509 = vmatpush3.bf16.msra.mxu0 %v2710_v7 }
 0x413   : > { %2510 = vmatprep.subr.bf16.mxu0 %v3107_v8 }
 0x416   : > { %2511 = vmatpush3.bf16.msra.mxu0 %v2711_v9 }
 0x417   : > { %2512 = vmatprep.subr.bf16.mxu0 %v3107_v8 }
 0x41a   : > { %2513 = vmatpush3.bf16.msra.mxu0 %v2712_v13 }
 0x41b   : > { %2514 = vmatprep.subr.bf16.mxu0 %v3107_v8 }
 0x41e   : > { %2515 = vmatpush3.bf16.msra.mxu0 %v2713_v10 }
 0x41f   : > { %2516 = vmatprep.subr.bf16.mxu0 %v3107_v8 }
 0x422   : > { %2517 = vmatpush3.bf16.msra.mxu0 %v2714_v12 }
 0x423   : > { %2518 = vmatprep.subr.bf16.mxu0 %v3107_v8 }
 0x426   : > { %2519 = vmatpush3.bf16.msra.mxu0 %v2715_v4 }
 0x427   : > { %2520 = vmatprep.subr.bf16.mxu0 %v3107_v8 }
 0x42a   : > { %2521 = vmatpush3.bf16.msra.mxu0 %v2716_v22 }
 0x4ad   : > { %v1505_v14 = vpop.f32.mrf.mxu1 }
 0x4af   : > { %v2464_v17 = vpop.f32.mrf.mxu1 }
 0x4b1   : > { %v1508_v18 = vpop.f32.mrf.mxu1 }
 0x4b3   : > { %v2465_v19 = vpop.f32.mrf.mxu1 }
 0x4cd   : > { %v1545_v11 = vpop.f32.mrf.mxu0 }
 0x4ce   : > { %v1551_v15 = vpack.c.bf16 %v1545_v11, %v1505_v14 }
 0x4cf   : > { %v2484_v16 = vpop.f32.mrf.mxu0 }
 0x4d0   : > { %2503 = vmatmul.mubr.bf16.vlgmr.msra.gmra.mxu1 %v1551_v15 }
 0x4d1   : > { %v1548_v20 = vpop.f32.mrf.mxu0 }
 0x4d3   : > { %v2485_v21 = vpop.f32.mrf.mxu0 }
 0x590   : > { %v1650_v23 = vpop.f32.mrf.mxu1 }
 0x591   : > { %v1657_v24 = vadd.f32 %v1650_v23, %v3485_v30 }
 0x592   : > { %v2504_v25 = vpop.f32.mrf.mxu1 }
 0x593   : > { %1767 = vst [vmem:[#allocation2] sm:$0xff] %v1657_v24 }
 0x594   : > { %v1653_v26 = vpop.f32.mrf.mxu1 }
 0x595   : > { %v1658_v27 = vadd.f32 %v1653_v26, %v3487_v31 }
 0x596   : > { %v2505_v28 = vpop.f32.mrf.mxu1 }
 0x597   : > { %v1659_v29 = vpack.c.bf16 %v1658_v27, %v1657_v24  ;;  %1768 = vst [vmem:[#allocation2 + $0x8] sm:$0xff] %v1658_v27 }
 0x599   : > { %2523 = vmatmul.mubr.bf16.vlgmr.msra.gmra.mxu0 %v1659_v29 }
 0x659   : > { %v1758_v33 = vpop.f32.mrf.mxu0 }
 0x65a   : > { %v1765_v34 = vadd.f32 %v1758_v33, %v644_v32 }
 0x65b   : > { %v2524_v35 = vpop.f32.mrf.mxu0 }
 0x65c   : > { %1769 = vst [vmem:[#allocation3 + $0x8] sm:$0xff] %v1765_v34  ;;  %1776 = sbr.rel (%p2150_p7) target bundleno = 1635 (0x663), region = 92 }
 0x65d   : > { %v1761_v8 = vpop.f32.mrf.mxu0 }
 0x65e   : > { %v1766_v37 = vadd.f32 %v1761_v8, %v645_v36 }
 0x65f   : > { %v2525_v38 = vpop.f32.mrf.mxu0 }
 0x660   : > { %1770 = vst [vmem:[#allocation3] sm:$0xff] %v1766_v37 }
 0x661   : > { %1777 = vst [vmem:[#allocation18] sm:$0xff] %v1657_v24  ;;  %1778 = vst [vmem:[#allocation18 + $0x8] sm:$0xff] %v1658_v27 }
 0x662   : > { %1779 = vst [vmem:[#allocation19] sm:$0xff] %v1765_v34  ;;  %1780 = vst [vmem:[#allocation19 + $0x8] sm:$0xff] %v1766_v37 }
 0x663 PF: > { %s3109_s23 = smov [#allocation18]   ;;  %p3797_p2 = scmp.eq.s32.totalorder %s3200_s19, 1 }
 0x664   : > { %s1795_s20 = sshll.u32 %s3109_s23, 4  ;;  %s1796_s20 = int_to_ptr.vmem [resolvable:$true] %s1795_s20 }
 0x665   : > { %s2943_s1 = scalar_lea.vmem %s1796_s20, 256  ;;  %p2950_p11 = scmp.lt.s32.totalorder %s1796_s20, %s1796_s20 }
 0x666   : > { %p2944_p13 = scmp.ne.s32.totalorder %s1796_s20, %s2943_s1  ;;  %p2951_p1 = scmp.lt.s32.totalorder %s2943_s1, %s2943_s1 }
 0x668   : > { %p2945_p10 = pnand %p2944_p13, %p3797_p2  ;;  %p2952_p3 = por %p2951_p1, %p2950_p11 }
 0x66a   : > { %p2946_p4 = pneg %p2945_p10 }
 0x66c   : > { %p2953_p8 = pnand %p2952_p3, %p2946_p4 }
 0x66e   : > { %2956 = shalt.err (!%p2953_p8)
}
 0x66f   : > { %s3110_s22 = smov 128   ;;  %s3111_s13 = smov 8  }
 0x670   : > { %p3798_p0 = pmov %p3797_p2  ;;  %s3112_s29 = smov [#allocation19]  }
 0x671   : > { %s1811_s11 = sshll.u32 %s3112_s29, 4  ;;  %s2165_s3 = sshll.u32 %s3087_s16, 7  ;;  %s1812_s11 = int_to_ptr.vmem [resolvable:$true] %s1811_s11 }
 0x672   : > { %2549 = dma.vmem_to_hbm [thread:$0]  (%p3798_p0), %s1796_s20, 256, %s3740_s8, [#allocation6], %s3110_s22, %s3110_s22, %s3111_s13  }
 0x673   : > { %s3799_s24 = sld [smem:[#allocation41_spill]]  ;;  %s2967_s27 = scalar_lea.vmem %s1812_s11, 256 }
 0x674   : > { %p2968_p6 = scmp.ne.s32.totalorder %s1812_s11, %s2967_s27  ;;  %p3800_p9 = pmov %p3798_p0 }
 0x675   : > { %p2974_p7 = scmp.lt.s32.totalorder %s1812_s11, %s1812_s11  ;;  %p2975_p13 = scmp.lt.s32.totalorder %s2967_s27, %s2967_s27 }
 0x676   : > { %p2969_p5 = pnand %p2968_p6, %p3800_p9 }
 0x677   : > { %p2976_p2 = por %p2975_p13, %p2974_p7 }
 0x678   : > { %p2970_p12 = pneg %p2969_p5 }
 0x679   : > { %s3665_s26 = scalar_lea.hbm %s3799_s24, %s2165_s3 }
 0x67a   : > { %p2977_p10 = pnand %p2976_p2, %p2970_p12 }
 0x67c   : > { %2980 = shalt.err (!%p2977_p10)
}
 0x67d   : > { %p3801_p4 = pmov %p3798_p0  ;;  %s3802_s28 = sld [smem:[#allocation40_spill]] }
 0x67e   : > { %s3803_s18 = sld [smem:[#allocation32_spill]]  ;;  %s1829_s0 = sshll.u32 %s3439_s25, 4  ;;  %s3675_s0 = int_to_ptr.vmem [resolvable:$true] %s1829_s0 }
 0x67f   : > { %s1782_s12 = scalar_lea.sflag [#allocation6], %s3412_s2  ;;  %s2991_s23 = scalar_lea.vmem %s3675_s0, 128 }
 0x680   : > { %p2992_p11 = scmp.ne.s32.totalorder %s3675_s0, %s2991_s23  ;;  %s3113_s20 = smov [#allocation21]  }
 0x681   : > { %s2995_s1 = sshll.u32 %s3113_s20, 4  ;;  %s2996_s1 = int_to_ptr.vmem [resolvable:$false] %s2995_s1 }
 0x682   : > { %s2997_s17 = scalar_lea.vmem %s2996_s1, 256  ;;  %p2998_p0 = scmp.lt.s32.totalorder %s3675_s0, %s2996_s1 }
 0x683   : > { %2551 = dma.vmem_to_hbm [thread:$0]  (%p3801_p4), %s1812_s11, 256, %s3802_s28, [#allocation20], %s3110_s22, %s3110_s22, %s3111_s13  }
 0x684   : > { %p3804_p1 = scmp.ne.s32.totalorder %s3803_s18, 0  ;;  %p2999_p6 = scmp.lt.s32.totalorder %s2997_s17, %s2991_s23 }
 0x686   : > { %p2993_p3 = pnand %p2992_p11, %p3804_p1  ;;  %p3000_p9 = por %p2999_p6, %p2998_p0 }
 0x688   : > { %p2994_p8 = pneg %p2993_p3 }
 0x68a   : > { %p3001_p5 = pnand %p3000_p9, %p2994_p8 }
 0x68c   : > { %3004 = shalt.err (!%p3001_p5)
}
 0x68d   : > { %s3005_s25 = scalar_lea.hbm %s3665_s26, 128  ;;  %s3009_s30 = scalar_lea.hbm %s3799_s24, 256 }
 0x68e   : > { %p3006_p12 = scmp.ne.s32.totalorder %s3665_s26, %s3005_s25  ;;  %p3010_p2 = scmp.lt.s32.totalorder %s3665_s26, %s3799_s24 }
 0x68f   : > { %p3011_p10 = scmp.lt.s32.totalorder %s3009_s30, %s3005_s25 }
 0x690   : > { %p3007_p7 = pnand %p3006_p12, %p3804_p1 }
 0x691   : > { %p3012_p4 = por %p3011_p10, %p3010_p2 }
 0x692   : > { %p3008_p13 = pneg %p3007_p7 }
 0x694   : > { %p3013_p11 = pnand %p3012_p4, %p3008_p13 }
 0x696   : > { %3016 = shalt.err (!%p3013_p11)
}
 0x697   : > { %s3114_s3 = smov 64   ;;  %s3115_s9 = smov 4  }
 0x698   : > { %2552 = dma.vmem_to_hbm [thread:$0]  (%p3804_p1), %s3675_s0, 128, %s3665_s26, %s1782_s12, %s3114_s3, %s3114_s3, %s3115_s9  }
 0x699   : > { %p3805_p3 = scmp.eq.s32.totalorder %s3200_s19, 1 }
 0x69b   : > { %3062 = dma.done.wait (%p3805_p3), [#allocation6], 256   ;;  %p3806_p8 = pmov %p3805_p3 }
 0x69c   : > { %p3807_p0 = pmov %p3805_p3 }
 0x69d   : > { %3064 = vsyncadd (%p3806_p8), [#allocation6], 4294967040 }
 0x69e   : > { %3066 = dma.done.wait (%p3807_p0), [#allocation20], 256   ;;  %p3808_p6 = pmov %p3807_p0 }
 0x6a0   : > { %3068 = vsyncadd (%p3808_p6), [#allocation20], 4294967040 }
 0x6a1 PF: > { %s3809_s21 = sld [smem:[#allocation31_spill]] }
 0x6a2   : > { %s3811_s10 = sld [smem:[#allocation33_spill]] }
 0x6a7   : > { %s3810_s27 = sadd.s32 4294967294, %s3809_s21   ;;  %p3813_p5 = scmp.ge.s32.totalorder %s3809_s21, 2 }
 0x6a8   : > { %s1852_s16 = sand.u32 1, %s3810_s27   ;;  %p3812_p9 = scmp.ne.s32.totalorder %s3811_s10, 0 }
 0x6a9   : > { %s1853_s2 = scalar_lea.sflag [#allocation6], %s1852_s16 }
 0x6aa   : > { %p2585_p1 = pnand %p3813_p5, %p3812_p9 }
 0x6ac   : > { %p2586_p12 = pneg %p2585_p1 }
 0x6ae   : > { %3070 = dma.done.wait (%p2586_p12), %s1853_s2, 128  }
 0x6af   : > { %3072 = vsyncadd (%p2586_p12), %s1853_s2, 4294967168  ;;  %s34_s18 = sadd.s32 1, %s3809_s21   ;;  %s3814_s19 = sld [smem:[#allocation35_spill]] }
 0x6b0   : > { %p31_p7 = scmp.ge.s32.totalorder %s34_s18, 4   ;;  %s3815_s16 = sld [smem:[#allocation30_spill]] }
 0x6b1   : > { %s3816_s17 = sld [smem:[#allocation34_spill]]  ;;  %s3817_s13 = smov %s3079_s14 }
 0x6b2   : > { %s3818_s14 = smov %s3083_s15  ;;  %33 = sbr.rel (!%p31_p7) target bundleno = 19 (0x13), region = 186 }
 0x6b5   : > { %s3819_s15 = smov %s3814_s19 }
 0x6b7   :  { %1858 = vsyncpa [#allocation5], 1 }
 0x6b8   :  { %1860 = vsyncpa [#allocation5 + $0x1], 1 }
 0x6b9   :  { %1861 = vsyncpa [#allocation8], 1 }
 0x6ba   :  { %1862 = vsyncpa [#allocation11], 1 }
 0x6bb   :  { %1864 = vsyncpa [#allocation11 + $0x1], 1 }
 0x6bc   :  { %1865 = vsyncpa [#allocation14], 1 }
 0x6bd   :  { %1867 = vsyncpa [#allocation14 + $0x1], 1 }
 0x6be   :  { %1868 = vsyncpa [#allocation17], 1 }
 0x6bf   :  { %1870 = vsyncpa [#allocation17 + $0x1], 1 }
 0x6c0   :  { %1871 = vsyncpa [#allocation6], 1 }
 0x6c1   :  { %1873 = vsyncpa [#allocation6 + $0x1], 1 }
 0x6c2   :  { %1874 = vsyncpa [#allocation20], 1 }

</bundles_post_ra>
